<compile_context>
chip_gen: v6e
topology: v6e:2x2x1
jax: 0.10.0
libtpu: 0.0.40
codegen_flags: <defaults>
</compile_context>

<pallas_src>
import functools

import jax
import jax.numpy as jnp
from jax import lax
from jax.experimental import pallas as pl
from jax.experimental.pallas import tpu as pltpu


# --------------------------------------------------------------------------------------
# Kernel
# --------------------------------------------------------------------------------------
def _fused_block_kernel(x_ref, g1_ref, b1_ref, wqkv_ref, bqkv_ref, wo_ref, bo_ref,
                        g2_ref, b2_ref, wfc_ref, bfc_ref, wproj_ref, bproj_ref,
                        o_ref, acc_ref, *, n_head, approx_gelu):
    """One ResidualAttentionBlock applied to a (Bt, S, D) batch tile.

    Grid = (batch_tile, layer).  acc_ref (f32 VMEM scratch) holds the residual stream
    across the inner ('arbitrary') layer axis; o_ref is written only at the last layer.
    """
    eps = 1e-5
    layer = pl.program_id(1)
    n_layers = pl.num_programs(1)

    @pl.when(layer == 0)
    def _():
        acc_ref[...] = x_ref[...].astype(jnp.float32)

    Bt, S, D = acc_ref.shape
    H = n_head
    hd = D // H
    N = Bt * S

    x = acc_ref[...].reshape(N, D)                              # f32 residual stream, rows = (b, s)

    # ---- LayerNorm 1 (ln_1), f32 ----
    mu = jnp.mean(x, axis=-1, keepdims=True)
    xc = x - mu
    var = jnp.mean(xc * xc, axis=-1, keepdims=True)
    h = xc * lax.rsqrt(var + eps) * g1_ref[0] + b1_ref[0]       # (N, D)

    # ---- Multi-head self-attention (q = k = v = h) ----
    # 1/sqrt(hd) scale is already folded into the q slice of wqkv/bqkv.
    # Add bias and cast to bf16 immediately: a single live (N, 3D) bf16 copy.
    qkv = (jnp.dot(h.astype(jnp.bfloat16), wqkv_ref[0],
                   preferred_element_type=jnp.float32) + bqkv_ref[0]).astype(jnp.bfloat16)

    def gather_heads(base):
        # Head-major stacking along the leading (batch) axis -> (H*Bt, S, hd).
        parts = [qkv[:, base + hi * hd: base + (hi + 1) * hd].reshape(Bt, S, hd)
                 for hi in range(H)]
        return jnp.concatenate(parts, axis=0)

    q = gather_heads(0)                                          # (H*Bt, S, hd) bf16
    k = gather_heads(D)
    v = gather_heads(2 * D)

    # One batched score matmul + ONE softmax over all heads (instead of H instances).
    s = jnp.einsum('bqd,bkd->bqk', q, k,
                   preferred_element_type=jnp.float32)           # (H*Bt, S, S) f32
    s = s - jnp.max(s, axis=-1, keepdims=True)
    p = jnp.exp(s)
    p = p * pl.reciprocal(jnp.sum(p, axis=-1, keepdims=True), approx=True)
    ctx = jnp.einsum('bqk,bkd->bqd', p.astype(jnp.bfloat16), v,
                     preferred_element_type=jnp.float32)         # (H*Bt, S, hd)
    ctx = ctx.reshape(H, Bt, S, hd)
    attn = jnp.concatenate([ctx[hi] for hi in range(H)], axis=-1).reshape(N, D)

    attn = jnp.dot(attn.astype(jnp.bfloat16), wo_ref[0],
                   preferred_element_type=jnp.float32) + bo_ref[0]
    x = x + attn                                                 # residual 1

    # ---- LayerNorm 2 (ln_2), f32 ----
    mu2 = jnp.mean(x, axis=-1, keepdims=True)
    xc2 = x - mu2
    var2 = jnp.mean(xc2 * xc2, axis=-1, keepdims=True)
    h2 = xc2 * lax.rsqrt(var2 + eps) * g2_ref[0] + b2_ref[0]

    # ---- MLP: c_fc -> GELU -> proj ----
    f = jnp.dot(h2.astype(jnp.bfloat16), wfc_ref[0],
                preferred_element_type=jnp.float32) + bfc_ref[0]            # (N, M)
    if approx_gelu:
        c = 0.7978845608028654  # sqrt(2/pi); tanh goes to the (otherwise idle) EUP slot.
        f = 0.5 * f * (1.0 + jnp.tanh(c * (f + 0.044715 * f * f * f)))
    else:
        f = 0.5 * f * (1.0 + lax.erf(f * (2.0 ** -0.5)))                    # nn.GELU default
    m = jnp.dot(f.astype(jnp.bfloat16), wproj_ref[0],
                preferred_element_type=jnp.float32) + bproj_ref[0]          # (N, D)
    x = x + m                                                    # residual 2

    acc_ref[...] = x.reshape(Bt, S, D)

    @pl.when(layer == n_layers - 1)
    def _():
        o_ref[...] = acc_ref[...].astype(o_ref.dtype)


# --------------------------------------------------------------------------------------
# VMEM-budget-aware tiling
# --------------------------------------------------------------------------------------
def _vmem_capacity_bytes():
    try:
        cap = getattr(pltpu.get_tpu_info(), "vmem_capacity_bytes", None)
        if cap:
            return int(cap)
    except Exception:
        pass
    return 64 * 1024 * 1024  # conservative fallback (v7x-sized)


def _num_tensorcores_sharing_grid():
    """2 on chips whose TensorCores share one Pallas grid via 'parallel' axes (v4/v5p/v7x)."""
    try:
        kind = jax.devices()[0].device_kind.lower()
    except Exception:
        return 1
    return 2 if any(t in kind for t in ("v4", "v5p", "v7")) else 1


def _tile_vmem_bytes(Bt, S, D, M, H, x_itemsize):
    """Rough per-step VMEM footprint: double-buffered bf16 weights + activation blocks
    + scratch + peak f32 intermediates."""
    N = Bt * S
    w = 2 * 2 * (3 * D * D + D * D + D * M + M * D)          # double-buffered bf16 matmul weights
    w += 2 * 4 * (3 * D + D + M + D + 4 * D)                 # f32 biases + LN params
    act_io = 2 * 2 * N * D * x_itemsize                      # input + output blocks, 2-deep each
    scratch = N * D * 4                                      # f32 residual accumulator
    interm = (N * 3 * D * (4 + 2)                            # qkv f32 dot output + bf16 copy
              + 2 * H * Bt * S * S * 4                       # scores + probs f32
              + N * M * 4                                    # MLP hidden f32
              + 3 * N * D * 4)                               # LN / residual temps
    return w + act_io + scratch + interm


def _pick_block_batch(B, S, D, M, H, x_itemsize, vmem_cap, min_tiles=1):
    """Largest divisor of B whose tile fits ~55% of VMEM (fewest weight re-streams from HBM),
    subject to keeping at least `min_tiles` batch tiles (2-TensorCore sharding)."""
    divisors = [d for d in range(1, B + 1) if B % d == 0]
    budget = int(0.55 * vmem_cap)
    feasible = [d for d in divisors
                if _tile_vmem_bytes(d, S, D, M, H, x_itemsize) <= budget]
    preferred = [d for d in feasible if B // d >= min_tiles]
    if preferred:
        return max(preferred)
    if feasible:
        return max(feasible)
    return 1


# --------------------------------------------------------------------------------------
# Wrappers
# --------------------------------------------------------------------------------------
def transformer_pallas(x_bsd, sp, n_head, *, block_batch=None, approx_gelu=False):
    """x_bsd: (B, S, D) batch-major activations; sp: layer-stacked params."""
    B, S, D = x_bsd.shape
    L = sp["wqkv"].shape[0]
    M = sp["wfc"].shape[2]
    H = n_head

    vmem_cap = _vmem_capacity_bytes()
    min_tiles = min(B, _num_tensorcores_sharing_grid())
    itemsize = jnp.dtype(x_bsd.dtype).itemsize
    Bt = (_pick_block_batch(B, S, D, M, H, itemsize, vmem_cap, min_tiles)
          if block_batch is None else block_batch)
    assert B % Bt == 0

    need = _tile_vmem_bytes(Bt, S, D, M, H, itemsize)
    vmem_limit = int(min(0.9 * vmem_cap, max(1.25 * need, 32 * 1024 * 1024)))

    def xmap(b, l):   # activation block: per batch tile, constant across layers
        return (b, 0, 0)

    def wmap(b, l):   # weight block: per layer
        return (l, 0, 0)

    in_specs = [
        pl.BlockSpec((Bt, S, D), xmap),          # x
        pl.BlockSpec((1, 1, D), wmap),           # ln_1 gamma
        pl.BlockSpec((1, 1, D), wmap),           # ln_1 beta
        pl.BlockSpec((1, D, 3 * D), wmap),       # in_proj W^T (q-scale folded)
        pl.BlockSpec((1, 1, 3 * D), wmap),       # in_proj bias
        pl.BlockSpec((1, D, D), wmap),           # out_proj W^T
        pl.BlockSpec((1, 1, D), wmap),           # out_proj bias
        pl.BlockSpec((1, 1, D), wmap),           # ln_2 gamma
        pl.BlockSpec((1, 1, D), wmap),           # ln_2 beta
        pl.BlockSpec((1, D, M), wmap),           # c_fc W^T
        pl.BlockSpec((1, 1, M), wmap),           # c_fc bias
        pl.BlockSpec((1, M, D), wmap),           # proj W^T
        pl.BlockSpec((1, 1, D), wmap),           # proj bias
    ]
    out_spec = pl.BlockSpec((Bt, S, D), xmap)    # constant across layer axis => VMEM-resident

    kernel = functools.partial(_fused_block_kernel, n_head=n_head, approx_gelu=approx_gelu)
    return pl.pallas_call(
        kernel,
        out_shape=jax.ShapeDtypeStruct((B, S, D), x_bsd.dtype),
        grid=(B // Bt, L),
        in_specs=in_specs,
        out_specs=out_spec,
        scratch_shapes=[pltpu.VMEM((Bt, S, D), jnp.float32)],   # f32 residual carried over layers
        compiler_params=pltpu.CompilerParams(
            dimension_semantics=("parallel", "arbitrary"),
            vmem_limit_bytes=vmem_limit),
    )(x_bsd,
      sp["g1"], sp["b1"], sp["wqkv"], sp["bqkv"], sp["wo"], sp["bo"],
      sp["g2"], sp["b2"], sp["wfc"], sp["bfc"], sp["wproj"], sp["bproj"])


def stack_and_prepare_params(layer_params, n_head, weight_dtype=jnp.bfloat16):
    """Stack per-layer params along a leading L axis, fold the attention scale into the
    q projection, and cast matmul weights to bf16 (biases / LN params stay f32)."""
    D = layer_params[0]["wqkv"].shape[0]
    assert D % n_head == 0, "width must be divisible by n_head"
    scale = 1.0 / float(D // n_head) ** 0.5

    def stack(name):
        return jnp.stack([p[name] for p in layer_params], axis=0)

    wqkv = stack("wqkv")                          # (L, D, 3D) f32
    bqkv = stack("bqkv")                          # (L, 1, 3D) f32
    wqkv = wqkv.at[:, :, :D].multiply(scale)      # fold 1/sqrt(hd) into q projection
    bqkv = bqkv.at[:, :, :D].multiply(scale)

    return dict(
        g1=stack("g1"), b1=stack("b1"),
        wqkv=wqkv.astype(weight_dtype), bqkv=bqkv,
        wo=stack("wo").astype(weight_dtype), bo=stack("bo"),
        g2=stack("g2"), b2=stack("b2"),
        wfc=stack("wfc").astype(weight_dtype), bfc=stack("bfc"),
        wproj=stack("wproj").astype(weight_dtype), bproj=stack("bproj"),
    )


def transformer_forward(x_sbd, layer_params, n_head, *, approx_gelu=False):
    """x_sbd: (S, B, D) seq-first, like the torch module. Returns (S, B, D)."""
    D = x_sbd.shape[-1]
    assert D % n_head == 0, "width must be divisible by n_head"
    sp = stack_and_prepare_params(layer_params, n_head)
    x = jnp.transpose(x_sbd, (1, 0, 2))          # (B, S, D) once for the whole stack
    y = transformer_pallas(x, sp, n_head, approx_gelu=approx_gelu)
    return jnp.transpose(y, (1, 0, 2))           # back to (S, B, D)


# --------------------------------------------------------------------------------------
# Synthetic params + pure-JAX reference
# --------------------------------------------------------------------------------------
def init_params(key, width, layers, mlp_ratio=4.0):
    """Weights stored (in, out) — already transposed relative to torch Linear (out, in)."""
    D = width
    M = int(D * mlp_ratio)
    params = []
    for _ in range(layers):
        key, k0, k1, k2, k3, k4, k5 = jax.random.split(key, 7)
        params.append(dict(
            g1=jnp.ones((1, D), jnp.float32), b1=jnp.zeros((1, D), jnp.float32),
            wqkv=0.02 * jax.random.normal(k0, (D, 3 * D), jnp.float32),
            bqkv=jnp.zeros((1, 3 * D), jnp.float32),
            wo=0.02 * jax.random.normal(k1, (D, D), jnp.float32),
            bo=jnp.zeros((1, D), jnp.float32),
            g2=jnp.ones((1, D), jnp.float32), b2=jnp.zeros((1, D), jnp.float32),
            wfc=0.02 * jax.random.normal(k2, (D, M), jnp.float32),
            bfc=0.02 * jax.random.normal(k3, (1, M), jnp.float32),
            wproj=0.02 * jax.random.normal(k4, (M, D), jnp.float32),
            bproj=0.02 * jax.random.normal(k5, (1, D), jnp.float32),
        ))
    return params


def _layernorm(x, g, b, eps=1e-5):
    mu = jnp.mean(x, -1, keepdims=True)
    var = jnp.mean((x - mu) ** 2, -1, keepdims=True)
    return (x - mu) * lax.rsqrt(var + eps) * g + b


def _reference_forward(x_sbd, layer_params, n_head):
    """Pure-JAX f32 reference mirroring the torch module (attn_mask=None, dropout=0)."""
    S, B, D = x_sbd.shape
    H = n_head
    hd = D // H
    x = x_sbd.astype(jnp.float32)
    for p in layer_params:
        h = _layernorm(x, p["g1"][0], p["b1"][0])
        qkv = h @ p["wqkv"] + p["bqkv"][0]
        q, k, v = qkv[..., :D], qkv[..., D:2 * D], qkv[..., 2 * D:]
        q = q.reshape(S, B, H, hd).transpose(1, 2, 0, 3)
        k = k.reshape(S, B, H, hd).transpose(1, 2, 0, 3)
        v = v.reshape(S, B, H, hd).transpose(1, 2, 0, 3)
        s = jnp.einsum('bhqd,bhkd->bhqk', q, k) / jnp.sqrt(float(hd))
        pmat = jax.nn.softmax(s, axis=-1)
        ctx = jnp.einsum('bhqk,bhkd->bhqd', pmat, v)
        ctx = ctx.transpose(2, 0, 1, 3).reshape(S, B, D)
        x = x + (ctx @ p["wo"] + p["bo"][0])
        h2 = _layernorm(x, p["g2"][0], p["b2"][0])
        f = h2 @ p["wfc"] + p["bfc"][0]
        f = 0.5 * f * (1.0 + lax.erf(f * (2.0 ** -0.5)))
        x = x + (f @ p["wproj"] + p["bproj"][0])
    return x


if __name__ == "__main__":
    # Small shapes consistent with the module: Transformer(width=32, layers=2, heads=4)
    # applied to x of shape (seq=8, batch=2, width=32).
    SEQ, BATCH, WIDTH, HEADS, LAYERS = 8, 2, 32, 4, 2

    key = jax.random.PRNGKey(0)
    key, xk = jax.random.split(key)
    x = jax.random.normal(xk, (SEQ, BATCH, WIDTH), dtype=jnp.float32)

    layer_params = init_params(key, WIDTH, LAYERS)

    out = transformer_forward(x, layer_params, HEADS)
    out = jax.block_until_ready(out)
    assert out.shape == (SEQ, BATCH, WIDTH), out.shape

    # Numerical sanity check against the pure-JAX f32 reference (bf16 weights + approx
    # reciprocal in the kernel => loose tolerance).
    ref = _reference_forward(x, layer_params, HEADS)
    err = float(jnp.max(jnp.abs(out - ref)))
    assert err < 2e-2, f"max abs err {err}"

    print("KERNEL_OK")
</pallas_src>

<mosaic_0001>
module attributes {stable_mosaic.version = 11 : i64} {
  func.func @_fused_block_kernel(%arg0: i32, %arg1: i32, %arg2: memref<2x8x32xf32, #tpu.memory_space<vmem>>, %arg3: memref<1x1x32xf32, #tpu.memory_space<vmem>>, %arg4: memref<1x1x32xf32, #tpu.memory_space<vmem>>, %arg5: memref<1x32x96xbf16, #tpu.memory_space<vmem>>, %arg6: memref<1x1x96xf32, #tpu.memory_space<vmem>>, %arg7: memref<1x32x32xbf16, #tpu.memory_space<vmem>>, %arg8: memref<1x1x32xf32, #tpu.memory_space<vmem>>, %arg9: memref<1x1x32xf32, #tpu.memory_space<vmem>>, %arg10: memref<1x1x32xf32, #tpu.memory_space<vmem>>, %arg11: memref<1x32x128xbf16, #tpu.memory_space<vmem>>, %arg12: memref<1x1x128xf32, #tpu.memory_space<vmem>>, %arg13: memref<1x128x32xbf16, #tpu.memory_space<vmem>>, %arg14: memref<1x1x32xf32, #tpu.memory_space<vmem>>, %arg15: memref<2x8x32xf32, #tpu.memory_space<vmem>>, %arg16: memref<2x8x32xf32, #tpu.memory_space<vmem>>) attributes {dimension_semantics = [#tpu.dimension_semantics<parallel>, #tpu.dimension_semantics<arbitrary>], iteration_bounds = array<i64: 1, 2>, scalar_prefetch = 0 : i64, scratch_operands = 1 : i64, tpu.core_type = #tpu.core_type<tc>, window_params = [{transform_indices = @transform_0, window_bounds = array<i64: 2, 8, 32>}, {transform_indices = @transform_1, window_bounds = array<i64: 1, 1, 32>}, {transform_indices = @transform_2, window_bounds = array<i64: 1, 1, 32>}, {transform_indices = @transform_3, window_bounds = array<i64: 1, 32, 96>}, {transform_indices = @transform_4, window_bounds = array<i64: 1, 1, 96>}, {transform_indices = @transform_5, window_bounds = array<i64: 1, 32, 32>}, {transform_indices = @transform_6, window_bounds = array<i64: 1, 1, 32>}, {transform_indices = @transform_7, window_bounds = array<i64: 1, 1, 32>}, {transform_indices = @transform_8, window_bounds = array<i64: 1, 1, 32>}, {transform_indices = @transform_9, window_bounds = array<i64: 1, 32, 128>}, {transform_indices = @transform_10, window_bounds = array<i64: 1, 1, 128>}, {transform_indices = @transform_11, window_bounds = array<i64: 1, 128, 32>}, {transform_indices = @transform_12, window_bounds = array<i64: 1, 1, 32>}, {transform_indices = @transform_13, window_bounds = array<i64: 2, 8, 32>}]} {
    %c0_i32 = arith.constant 0 : i32
    %0 = arith.cmpi eq, %arg1, %c0_i32 : i32
    %1 = arith.extui %0 : i1 to i32
    %c0_i32_0 = arith.constant 0 : i32
    %2 = arith.cmpi ne, %1, %c0_i32_0 : i32
    scf.if %2 {
      %c0_63 = arith.constant 0 : index
      %c0_64 = arith.constant 0 : index
      %c0_65 = arith.constant 0 : index
      %152 = vector.load %arg2[%c0_63, %c0_64, %c0_65] : memref<2x8x32xf32, #tpu.memory_space<vmem>>, vector<2x8x32xf32>
      %c0_66 = arith.constant 0 : index
      %c0_67 = arith.constant 0 : index
      %c0_68 = arith.constant 0 : index
      %153 = vector.load %arg16[%c0_66, %c0_67, %c0_68] : memref<2x8x32xf32, #tpu.memory_space<vmem>>, vector<2x8x32xf32>
      tpu.vector_store %arg16[%c0_66, %c0_67, %c0_68], %152 {strides = array<i32>} : memref<2x8x32xf32, #tpu.memory_space<vmem>>, vector<2x8x32xf32>,
    } else {
    }
    %c0 = arith.constant 0 : index
    %c0_1 = arith.constant 0 : index
    %c0_2 = arith.constant 0 : index
    %3 = vector.load %arg16[%c0, %c0_1, %c0_2] : memref<2x8x32xf32, #tpu.memory_space<vmem>>, vector<2x8x32xf32>
    %4 = vector.shape_cast %3 : vector<2x8x32xf32> to vector<16x32xf32>
    %cst = arith.constant dense<0.000000e+00> : vector<16xf32>
    %5 = vector.multi_reduction <add>, %4, %cst [1] : vector<16x32xf32> to vector<16xf32>
    %6 = vector.shape_cast %5 : vector<16xf32> to vector<16x1xf32>
    %cst_3 = arith.constant 3.200000e+01 : f32
    %7 = vector.broadcast %cst_3 : f32 to vector<16x1xf32>
    %8 = arith.divf %6, %7 : vector<16x1xf32>
    %9 = vector.broadcast %8 : vector<16x1xf32> to vector<16x32xf32>
    %10 = arith.subf %4, %9 : vector<16x32xf32>
    %11 = arith.mulf %10, %10 : vector<16x32xf32>
    %cst_4 = arith.constant dense<0.000000e+00> : vector<16xf32>
    %12 = vector.multi_reduction <add>, %11, %cst_4 [1] : vector<16x32xf32> to vector<16xf32>
    %13 = vector.shape_cast %12 : vector<16xf32> to vector<16x1xf32>
    %cst_5 = arith.constant 3.200000e+01 : f32
    %14 = vector.broadcast %cst_5 : f32 to vector<16x1xf32>
    %15 = arith.divf %13, %14 : vector<16x1xf32>
    %cst_6 = arith.constant 9.99999974E-6 : f32
    %16 = vector.broadcast %cst_6 : f32 to vector<16x1xf32>
    %17 = arith.addf %15, %16 : vector<16x1xf32>
    %18 = math.rsqrt %17 : vector<16x1xf32>
    %19 = vector.broadcast %18 : vector<16x1xf32> to vector<16x32xf32>
    %20 = arith.mulf %10, %19 : vector<16x32xf32>
    %c0_7 = arith.constant 0 : index
    %c0_8 = arith.constant 0 : index
    %c0_9 = arith.constant 0 : index
    %21 = vector.load %arg3[%c0_7, %c0_8, %c0_9] : memref<1x1x32xf32, #tpu.memory_space<vmem>>, vector<1x1x32xf32>
    %22 = vector.shape_cast %21 : vector<1x1x32xf32> to vector<1x32xf32>
    %23 = vector.broadcast %22 : vector<1x32xf32> to vector<16x32xf32>
    %24 = arith.mulf %20, %23 : vector<16x32xf32>
    %c0_10 = arith.constant 0 : index
    %c0_11 = arith.constant 0 : index
    %c0_12 = arith.constant 0 : index
    %25 = vector.load %arg4[%c0_10, %c0_11, %c0_12] : memref<1x1x32xf32, #tpu.memory_space<vmem>>, vector<1x1x32xf32>
    %26 = vector.shape_cast %25 : vector<1x1x32xf32> to vector<1x32xf32>
    %27 = vector.broadcast %26 : vector<1x32xf32> to vector<16x32xf32>
    %28 = arith.addf %24, %27 : vector<16x32xf32>
    %29 = arith.truncf %28 : vector<16x32xf32> to vector<16x32xbf16>
    %c0_13 = arith.constant 0 : index
    %c0_14 = arith.constant 0 : index
    %c0_15 = arith.constant 0 : index
    %30 = vector.load %arg5[%c0_13, %c0_14, %c0_15] : memref<1x32x96xbf16, #tpu.memory_space<vmem>>, vector<1x32x96xbf16>
    %31 = vector.shape_cast %30 : vector<1x32x96xbf16> to vector<32x96xbf16>
    %cst_16 = arith.constant dense<0.000000e+00> : vector<16x96xf32>
    %32 = tpu.matmul %29, %31, %cst_16 {dimension_numbers = #tpu.dot_dimension_numbers<[1], [0], [0], [1], [0, 0, 1, 1], [], []>} : vector<16x32xbf16>, vector<32x96xbf16>, vector<16x96xf32> -> vector<16x96xf32>
    %c0_17 = arith.constant 0 : index
    %c0_18 = arith.constant 0 : index
    %c0_19 = arith.constant 0 : index
    %33 = vector.load %arg6[%c0_17, %c0_18, %c0_19] : memref<1x1x96xf32, #tpu.memory_space<vmem>>, vector<1x1x96xf32>
    %34 = vector.shape_cast %33 : vector<1x1x96xf32> to vector<1x96xf32>
    %35 = vector.broadcast %34 : vector<1x96xf32> to vector<16x96xf32>
    %36 = arith.addf %32, %35 : vector<16x96xf32>
    %37 = arith.truncf %36 : vector<16x96xf32> to vector<16x96xbf16>
    %38 = vector.extract_strided_slice %37 {offsets = [0, 0], sizes = [16, 8], strides = [1, 1]} : vector<16x96xbf16> to vector<16x8xbf16>
    %39 = vector.shape_cast %38 : vector<16x8xbf16> to vector<2x8x8xbf16>
    %40 = vector.extract_strided_slice %37 {offsets = [0, 8], sizes = [16, 8], strides = [1, 1]} : vector<16x96xbf16> to vector<16x8xbf16>
    %41 = vector.shape_cast %40 : vector<16x8xbf16> to vector<2x8x8xbf16>
    %42 = vector.extract_strided_slice %37 {offsets = [0, 16], sizes = [16, 8], strides = [1, 1]} : vector<16x96xbf16> to vector<16x8xbf16>
    %43 = vector.shape_cast %42 : vector<16x8xbf16> to vector<2x8x8xbf16>
    %44 = vector.extract_strided_slice %37 {offsets = [0, 24], sizes = [16, 8], strides = [1, 1]} : vector<16x96xbf16> to vector<16x8xbf16>
    %45 = vector.shape_cast %44 : vector<16x8xbf16> to vector<2x8x8xbf16>
    %46 = tpu.concatenate %39, %41, %43, %45 in 0 : vector<2x8x8xbf16>, vector<2x8x8xbf16>, vector<2x8x8xbf16>, vector<2x8x8xbf16> -> vector<8x8x8xbf16>
    %47 = vector.extract_strided_slice %37 {offsets = [0, 32], sizes = [16, 8], strides = [1, 1]} : vector<16x96xbf16> to vector<16x8xbf16>
    %48 = vector.shape_cast %47 : vector<16x8xbf16> to vector<2x8x8xbf16>
    %49 = vector.extract_strided_slice %37 {offsets = [0, 40], sizes = [16, 8], strides = [1, 1]} : vector<16x96xbf16> to vector<16x8xbf16>
    %50 = vector.shape_cast %49 : vector<16x8xbf16> to vector<2x8x8xbf16>
    %51 = vector.extract_strided_slice %37 {offsets = [0, 48], sizes = [16, 8], strides = [1, 1]} : vector<16x96xbf16> to vector<16x8xbf16>
    %52 = vector.shape_cast %51 : vector<16x8xbf16> to vector<2x8x8xbf16>
    %53 = vector.extract_strided_slice %37 {offsets = [0, 56], sizes = [16, 8], strides = [1, 1]} : vector<16x96xbf16> to vector<16x8xbf16>
    %54 = vector.shape_cast %53 : vector<16x8xbf16> to vector<2x8x8xbf16>
    %55 = tpu.concatenate %48, %50, %52, %54 in 0 : vector<2x8x8xbf16>, vector<2x8x8xbf16>, vector<2x8x8xbf16>, vector<2x8x8xbf16> -> vector<8x8x8xbf16>
    %56 = vector.extract_strided_slice %37 {offsets = [0, 64], sizes = [16, 8], strides = [1, 1]} : vector<16x96xbf16> to vector<16x8xbf16>
    %57 = vector.shape_cast %56 : vector<16x8xbf16> to vector<2x8x8xbf16>
    %58 = vector.extract_strided_slice %37 {offsets = [0, 72], sizes = [16, 8], strides = [1, 1]} : vector<16x96xbf16> to vector<16x8xbf16>
    %59 = vector.shape_cast %58 : vector<16x8xbf16> to vector<2x8x8xbf16>
    %60 = vector.extract_strided_slice %37 {offsets = [0, 80], sizes = [16, 8], strides = [1, 1]} : vector<16x96xbf16> to vector<16x8xbf16>
    %61 = vector.shape_cast %60 : vector<16x8xbf16> to vector<2x8x8xbf16>
    %62 = vector.extract_strided_slice %37 {offsets = [0, 88], sizes = [16, 8], strides = [1, 1]} : vector<16x96xbf16> to vector<16x8xbf16>
    %63 = vector.shape_cast %62 : vector<16x8xbf16> to vector<2x8x8xbf16>
    %64 = tpu.concatenate %57, %59, %61, %63 in 0 : vector<2x8x8xbf16>, vector<2x8x8xbf16>, vector<2x8x8xbf16>, vector<2x8x8xbf16> -> vector<8x8x8xbf16>
    "tpu.trace_start"() <{level = 10 : i32, message = "bqd,bkd->bqk"}> : () -> ()
    %cst_20 = arith.constant dense<0.000000e+00> : vector<8x8x8xf32>
    %65 = tpu.matmul %46, %55, %cst_20 {dimension_numbers = #tpu.dot_dimension_numbers<[2], [2], [1], [1], [0, 0, 0, 1, 1, 1], [0], [0]>} : vector<8x8x8xbf16>, vector<8x8x8xbf16>, vector<8x8x8xf32> -> vector<8x8x8xf32>
    "tpu.trace_stop"() : () -> ()
    %cst_21 = arith.constant dense<0xFF800000> : vector<8x8xf32>
    %66 = vector.multi_reduction <maximumf>, %65, %cst_21 [2] : vector<8x8x8xf32> to vector<8x8xf32>
    %67 = vector.shape_cast %66 : vector<8x8xf32> to vector<8x8x1xf32>
    %68 = vector.broadcast %67 : vector<8x8x1xf32> to vector<8x8x8xf32>
    %69 = arith.subf %65, %68 : vector<8x8x8xf32>
    %70 = math.exp %69 : vector<8x8x8xf32>
    %cst_22 = arith.constant dense<0.000000e+00> : vector<8x8xf32>
    %71 = vector.multi_reduction <add>, %70, %cst_22 [2] : vector<8x8x8xf32> to vector<8x8xf32>
    %72 = vector.shape_cast %71 : vector<8x8xf32> to vector<8x8x1xf32>
    %73 = tpu.reciprocal %72 {approx = true} : vector<8x8x1xf32> -> vector<8x8x1xf32>
    %74 = vector.broadcast %73 : vector<8x8x1xf32> to vector<8x8x8xf32>
    %75 = arith.mulf %70, %74 : vector<8x8x8xf32>
    %76 = arith.truncf %75 : vector<8x8x8xf32> to vector<8x8x8xbf16>
    "tpu.trace_start"() <{level = 10 : i32, message = "bqk,bkd->bqd"}> : () -> ()
    %cst_23 = arith.constant dense<0.000000e+00> : vector<8x8x8xf32>
    %77 = tpu.matmul %76, %64, %cst_23 {dimension_numbers = #tpu.dot_dimension_numbers<[2], [1], [1], [2], [0, 0, 0, 1, 1, 2], [0], [0]>} : vector<8x8x8xbf16>, vector<8x8x8xbf16>, vector<8x8x8xf32> -> vector<8x8x8xf32>
    "tpu.trace_stop"() : () -> ()
    %78 = vector.shape_cast %77 : vector<8x8x8xf32> to vector<4x2x8x8xf32>
    %79 = vector.extract_strided_slice %78 {offsets = [0, 0, 0, 0], sizes = [1, 2, 8, 8], strides = [1, 1, 1, 1]} : vector<4x2x8x8xf32> to vector<1x2x8x8xf32>
    %80 = vector.shape_cast %79 : vector<1x2x8x8xf32> to vector<2x8x8xf32>
    %81 = vector.extract_strided_slice %78 {offsets = [1, 0, 0, 0], sizes = [1, 2, 8, 8], strides = [1, 1, 1, 1]} : vector<4x2x8x8xf32> to vector<1x2x8x8xf32>
    %82 = vector.shape_cast %81 : vector<1x2x8x8xf32> to vector<2x8x8xf32>
    %83 = vector.extract_strided_slice %78 {offsets = [2, 0, 0, 0], sizes = [1, 2, 8, 8], strides = [1, 1, 1, 1]} : vector<4x2x8x8xf32> to vector<1x2x8x8xf32>
    %84 = vector.shape_cast %83 : vector<1x2x8x8xf32> to vector<2x8x8xf32>
    %85 = vector.extract_strided_slice %78 {offsets = [3, 0, 0, 0], sizes = [1, 2, 8, 8], strides = [1, 1, 1, 1]} : vector<4x2x8x8xf32> to vector<1x2x8x8xf32>
    %86 = vector.shape_cast %85 : vector<1x2x8x8xf32> to vector<2x8x8xf32>
    %87 = tpu.concatenate %80, %82, %84, %86 in 2 : vector<2x8x8xf32>, vector<2x8x8xf32>, vector<2x8x8xf32>, vector<2x8x8xf32> -> vector<2x8x32xf32>
    %88 = vector.shape_cast %87 : vector<2x8x32xf32> to vector<16x32xf32>
    %89 = arith.truncf %88 : vector<16x32xf32> to vector<16x32xbf16>
    %c0_24 = arith.constant 0 : index
    %c0_25 = arith.constant 0 : index
    %c0_26 = arith.constant 0 : index
    %90 = vector.load %arg7[%c0_24, %c0_25, %c0_26] : memref<1x32x32xbf16, #tpu.memory_space<vmem>>, vector<1x32x32xbf16>
    %91 = vector.shape_cast %90 : vector<1x32x32xbf16> to vector<32x32xbf16>
    %cst_27 = arith.constant dense<0.000000e+00> : vector<16x32xf32>
    %92 = tpu.matmul %89, %91, %cst_27 {dimension_numbers = #tpu.dot_dimension_numbers<[1], [0], [0], [1], [0, 0, 1, 1], [], []>} : vector<16x32xbf16>, vector<32x32xbf16>, vector<16x32xf32> -> vector<16x32xf32>
    %c0_28 = arith.constant 0 : index
    %c0_29 = arith.constant 0 : index
    %c0_30 = arith.constant 0 : index
    %93 = vector.load %arg8[%c0_28, %c0_29, %c0_30] : memref<1x1x32xf32, #tpu.memory_space<vmem>>, vector<1x1x32xf32>
    %94 = vector.shape_cast %93 : vector<1x1x32xf32> to vector<1x32xf32>
    %95 = vector.broadcast %94 : vector<1x32xf32> to vector<16x32xf32>
    %96 = arith.addf %92, %95 : vector<16x32xf32>
    %97 = arith.addf %4, %96 : vector<16x32xf32>
    %cst_31 = arith.constant dense<0.000000e+00> : vector<16xf32>
    %98 = vector.multi_reduction <add>, %97, %cst_31 [1] : vector<16x32xf32> to vector<16xf32>
    %99 = vector.shape_cast %98 : vector<16xf32> to vector<16x1xf32>
    %cst_32 = arith.constant 3.200000e+01 : f32
    %100 = vector.broadcast %cst_32 : f32 to vector<16x1xf32>
    %101 = arith.divf %99, %100 : vector<16x1xf32>
    %102 = vector.broadcast %101 : vector<16x1xf32> to vector<16x32xf32>
    %103 = arith.subf %97, %102 : vector<16x32xf32>
    %104 = arith.mulf %103, %103 : vector<16x32xf32>
    %cst_33 = arith.constant dense<0.000000e+00> : vector<16xf32>
    %105 = vector.multi_reduction <add>, %104, %cst_33 [1] : vector<16x32xf32> to vector<16xf32>
    %106 = vector.shape_cast %105 : vector<16xf32> to vector<16x1xf32>
    %cst_34 = arith.constant 3.200000e+01 : f32
    %107 = vector.broadcast %cst_34 : f32 to vector<16x1xf32>
    %108 = arith.divf %106, %107 : vector<16x1xf32>
    %cst_35 = arith.constant 9.99999974E-6 : f32
    %109 = vector.broadcast %cst_35 : f32 to vector<16x1xf32>
    %110 = arith.addf %108, %109 : vector<16x1xf32>
    %111 = math.rsqrt %110 : vector<16x1xf32>
    %112 = vector.broadcast %111 : vector<16x1xf32> to vector<16x32xf32>
    %113 = arith.mulf %103, %112 : vector<16x32xf32>
    %c0_36 = arith.constant 0 : index
    %c0_37 = arith.constant 0 : index
    %c0_38 = arith.constant 0 : index
    %114 = vector.load %arg9[%c0_36, %c0_37, %c0_38] : memref<1x1x32xf32, #tpu.memory_space<vmem>>, vector<1x1x32xf32>
    %115 = vector.shape_cast %114 : vector<1x1x32xf32> to vector<1x32xf32>
    %116 = vector.broadcast %115 : vector<1x32xf32> to vector<16x32xf32>
    %117 = arith.mulf %113, %116 : vector<16x32xf32>
    %c0_39 = arith.constant 0 : index
    %c0_40 = arith.constant 0 : index
    %c0_41 = arith.constant 0 : index
    %118 = vector.load %arg10[%c0_39, %c0_40, %c0_41] : memref<1x1x32xf32, #tpu.memory_space<vmem>>, vector<1x1x32xf32>
    %119 = vector.shape_cast %118 : vector<1x1x32xf32> to vector<1x32xf32>
    %120 = vector.broadcast %119 : vector<1x32xf32> to vector<16x32xf32>
    %121 = arith.addf %117, %120 : vector<16x32xf32>
    %122 = arith.truncf %121 : vector<16x32xf32> to vector<16x32xbf16>
    %c0_42 = arith.constant 0 : index
    %c0_43 = arith.constant 0 : index
    %c0_44 = arith.constant 0 : index
    %123 = vector.load %arg11[%c0_42, %c0_43, %c0_44] : memref<1x32x128xbf16, #tpu.memory_space<vmem>>, vector<1x32x128xbf16>
    %124 = vector.shape_cast %123 : vector<1x32x128xbf16> to vector<32x128xbf16>
    %cst_45 = arith.constant dense<0.000000e+00> : vector<16x128xf32>
    %125 = tpu.matmul %122, %124, %cst_45 {dimension_numbers = #tpu.dot_dimension_numbers<[1], [0], [0], [1], [0, 0, 1, 1], [], []>} : vector<16x32xbf16>, vector<32x128xbf16>, vector<16x128xf32> -> vector<16x128xf32>
    %c0_46 = arith.constant 0 : index
    %c0_47 = arith.constant 0 : index
    %c0_48 = arith.constant 0 : index
    %126 = vector.load %arg12[%c0_46, %c0_47, %c0_48] : memref<1x1x128xf32, #tpu.memory_space<vmem>>, vector<1x1x128xf32>
    %127 = vector.shape_cast %126 : vector<1x1x128xf32> to vector<1x128xf32>
    %128 = vector.broadcast %127 : vector<1x128xf32> to vector<16x128xf32>
    %129 = arith.addf %125, %128 : vector<16x128xf32>
    %cst_49 = arith.constant 5.000000e-01 : f32
    %130 = vector.broadcast %cst_49 : f32 to vector<16x128xf32>
    %131 = arith.mulf %130, %129 : vector<16x128xf32>
    %cst_50 = arith.constant 0.707106769 : f32
    %132 = vector.broadcast %cst_50 : f32 to vector<16x128xf32>
    %133 = arith.mulf %129, %132 : vector<16x128xf32>
    %134 = math.erf %133 : vector<16x128xf32>
    %cst_51 = arith.constant 1.000000e+00 : f32
    %135 = vector.broadcast %cst_51 : f32 to vector<16x128xf32>
    %136 = arith.addf %135, %134 : vector<16x128xf32>
    %137 = arith.mulf %131, %136 : vector<16x128xf32>
    %138 = arith.truncf %137 : vector<16x128xf32> to vector<16x128xbf16>
    %c0_52 = arith.constant 0 : index
    %c0_53 = arith.constant 0 : index
    %c0_54 = arith.constant 0 : index
    %139 = vector.load %arg13[%c0_52, %c0_53, %c0_54] : memref<1x128x32xbf16, #tpu.memory_space<vmem>>, vector<1x128x32xbf16>
    %140 = vector.shape_cast %139 : vector<1x128x32xbf16> to vector<128x32xbf16>
    %cst_55 = arith.constant dense<0.000000e+00> : vector<16x32xf32>
    %141 = tpu.matmul %138, %140, %cst_55 {dimension_numbers = #tpu.dot_dimension_numbers<[1], [0], [0], [1], [0, 0, 1, 1], [], []>} : vector<16x128xbf16>, vector<128x32xbf16>, vector<16x32xf32> -> vector<16x32xf32>
    %c0_56 = arith.constant 0 : index
    %c0_57 = arith.constant 0 : index
    %c0_58 = arith.constant 0 : index
    %142 = vector.load %arg14[%c0_56, %c0_57, %c0_58] : memref<1x1x32xf32, #tpu.memory_space<vmem>>, vector<1x1x32xf32>
    %143 = vector.shape_cast %142 : vector<1x1x32xf32> to vector<1x32xf32>
    %144 = vector.broadcast %143 : vector<1x32xf32> to vector<16x32xf32>
    %145 = arith.addf %141, %144 : vector<16x32xf32>
    %146 = arith.addf %97, %145 : vector<16x32xf32>
    %147 = vector.shape_cast %146 : vector<16x32xf32> to vector<2x8x32xf32>
    %c0_59 = arith.constant 0 : index
    %c0_60 = arith.constant 0 : index
    %c0_61 = arith.constant 0 : index
    %148 = vector.load %arg16[%c0_59, %c0_60, %c0_61] : memref<2x8x32xf32, #tpu.memory_space<vmem>>, vector<2x8x32xf32>
    tpu.vector_store %arg16[%c0_59, %c0_60, %c0_61], %147 {strides = array<i32>} : memref<2x8x32xf32, #tpu.memory_space<vmem>>, vector<2x8x32xf32>,
    %c1_i32 = arith.constant 1 : i32
    %149 = arith.cmpi eq, %arg1, %c1_i32 : i32
    %150 = arith.extui %149 : i1 to i32
    %c0_i32_62 = arith.constant 0 : i32
    %151 = arith.cmpi ne, %150, %c0_i32_62 : i32
    scf.if %151 {
      %c0_63 = arith.constant 0 : index
      %c0_64 = arith.constant 0 : index
      %c0_65 = arith.constant 0 : index
      %152 = vector.load %arg16[%c0_63, %c0_64, %c0_65] : memref<2x8x32xf32, #tpu.memory_space<vmem>>, vector<2x8x32xf32>
      %c0_66 = arith.constant 0 : index
      %c0_67 = arith.constant 0 : index
      %c0_68 = arith.constant 0 : index
      %153 = vector.load %arg15[%c0_66, %c0_67, %c0_68] : memref<2x8x32xf32, #tpu.memory_space<vmem>>, vector<2x8x32xf32>
      tpu.vector_store %arg15[%c0_66, %c0_67, %c0_68], %152 {strides = array<i32>} : memref<2x8x32xf32, #tpu.memory_space<vmem>>, vector<2x8x32xf32>,
    } else {
    }
    return
  }
  func.func @transform_0(%arg0: i32, %arg1: i32) -> (i32, i32, i32) {
    %c0_i32 = arith.constant 0 : i32
    %c0_i32_0 = arith.constant 0 : i32
    %c0_i32_1 = arith.constant 0 : i32
    return %arg0, %c0_i32, %c0_i32_0 : i32, i32, i32
  }
  func.func @transform_1(%arg0: i32, %arg1: i32) -> (i32, i32, i32) {
    %c0_i32 = arith.constant 0 : i32
    %c0_i32_0 = arith.constant 0 : i32
    %c0_i32_1 = arith.constant 0 : i32
    return %arg1, %c0_i32, %c0_i32_0 : i32, i32, i32
  }
  func.func @transform_2(%arg0: i32, %arg1: i32) -> (i32, i32, i32) {
    %c0_i32 = arith.constant 0 : i32
    %c0_i32_0 = arith.constant 0 : i32
    %c0_i32_1 = arith.constant 0 : i32
    return %arg1, %c0_i32, %c0_i32_0 : i32, i32, i32
  }
  func.func @transform_3(%arg0: i32, %arg1: i32) -> (i32, i32, i32) {
    %c0_i32 = arith.constant 0 : i32
    %c0_i32_0 = arith.constant 0 : i32
    %c0_i32_1 = arith.constant 0 : i32
    return %arg1, %c0_i32, %c0_i32_0 : i32, i32, i32
  }
  func.func @transform_4(%arg0: i32, %arg1: i32) -> (i32, i32, i32) {
    %c0_i32 = arith.constant 0 : i32
    %c0_i32_0 = arith.constant 0 : i32
    %c0_i32_1 = arith.constant 0 : i32
    return %arg1, %c0_i32, %c0_i32_0 : i32, i32, i32
  }
  func.func @transform_5(%arg0: i32, %arg1: i32) -> (i32, i32, i32) {
    %c0_i32 = arith.constant 0 : i32
    %c0_i32_0 = arith.constant 0 : i32
    %c0_i32_1 = arith.constant 0 : i32
    return %arg1, %c0_i32, %c0_i32_0 : i32, i32, i32
  }
  func.func @transform_6(%arg0: i32, %arg1: i32) -> (i32, i32, i32) {
    %c0_i32 = arith.constant 0 : i32
    %c0_i32_0 = arith.constant 0 : i32
    %c0_i32_1 = arith.constant 0 : i32
    return %arg1, %c0_i32, %c0_i32_0 : i32, i32, i32
  }
  func.func @transform_7(%arg0: i32, %arg1: i32) -> (i32, i32, i32) {
    %c0_i32 = arith.constant 0 : i32
    %c0_i32_0 = arith.constant 0 : i32
    %c0_i32_1 = arith.constant 0 : i32
    return %arg1, %c0_i32, %c0_i32_0 : i32, i32, i32
  }
  func.func @transform_8(%arg0: i32, %arg1: i32) -> (i32, i32, i32) {
    %c0_i32 = arith.constant 0 : i32
    %c0_i32_0 = arith.constant 0 : i32
    %c0_i32_1 = arith.constant 0 : i32
    return %arg1, %c0_i32, %c0_i32_0 : i32, i32, i32
  }
  func.func @transform_9(%arg0: i32, %arg1: i32) -> (i32, i32, i32) {
    %c0_i32 = arith.constant 0 : i32
    %c0_i32_0 = arith.constant 0 : i32
    %c0_i32_1 = arith.constant 0 : i32
    return %arg1, %c0_i32, %c0_i32_0 : i32, i32, i32
  }
  func.func @transform_10(%arg0: i32, %arg1: i32) -> (i32, i32, i32) {
    %c0_i32 = arith.constant 0 : i32
    %c0_i32_0 = arith.constant 0 : i32
    %c0_i32_1 = arith.constant 0 : i32
    return %arg1, %c0_i32, %c0_i32_0 : i32, i32, i32
  }
  func.func @transform_11(%arg0: i32, %arg1: i32) -> (i32, i32, i32) {
    %c0_i32 = arith.constant 0 : i32
    %c0_i32_0 = arith.constant 0 : i32
    %c0_i32_1 = arith.constant 0 : i32
    return %arg1, %c0_i32, %c0_i32_0 : i32, i32, i32
  }
  func.func @transform_12(%arg0: i32, %arg1: i32) -> (i32, i32, i32) {
    %c0_i32 = arith.constant 0 : i32
    %c0_i32_0 = arith.constant 0 : i32
    %c0_i32_1 = arith.constant 0 : i32
    return %arg1, %c0_i32, %c0_i32_0 : i32, i32, i32
  }
  func.func @transform_13(%arg0: i32, %arg1: i32) -> (i32, i32, i32) {
    %c0_i32 = arith.constant 0 : i32
    %c0_i32_0 = arith.constant 0 : i32
    %c0_i32_1 = arith.constant 0 : i32
    return %arg0, %c0_i32, %c0_i32_0 : i32, i32, i32
  }
}

</mosaic_0001>

<bundles_post_ra>
// kernel: tpu_custom_call.1
= control target key start
LH: loop header
LB: loop body
LE: loop exit
PB: predicated region body
PF: predicated region fallthrough
CT: control target
= control target key end

     0   :  { %s3132_s0 = inlined_call_operand.vmem [shape: f32[2,8,32], index: 0, kind: input, shape index: {}]   ;;  %s3133_s1 = inlined_call_operand.vmem [shape: f32[2,1,32], index: 1, kind: input, shape index: {}]   ;;  %s3134_s2 = inlined_call_operand.vmem [shape: f32[2,1,32], index: 2, kind: input, shape index: {}]   ;;  %s3135_s3 = inlined_call_operand.vmem [shape: bf16[2,32,96], index: 3, kind: input, shape index: {}]   ;;  %s3136_s4 = inlined_call_operand.vmem [shape: f32[2,1,96], index: 4, kind: input, shape index: {}]   ;;  %s3137_s5 = inlined_call_operand.vmem [shape: bf16[2,32,32], index: 5, kind: input, shape index: {}]   ;;  %s3138_s6 = inlined_call_operand.vmem [shape: f32[2,1,32], index: 6, kind: input, shape index: {}]   ;;  %s3139_s7 = inlined_call_operand.vmem [shape: f32[2,1,32], index: 7, kind: input, shape index: {}]   ;;  %s3140_s8 = inlined_call_operand.vmem [shape: f32[2,1,32], index: 8, kind: input, shape index: {}]   ;;  %s3141_s9 = inlined_call_operand.vmem [shape: bf16[2,32,128], index: 9, kind: input, shape index: {}]   ;;  %s3142_s10 = inlined_call_operand.vmem [shape: f32[2,1,128], index: 10, kind: input, shape index: {}]   ;;  %s3143_s11 = inlined_call_operand.vmem [shape: bf16[2,128,32], index: 11, kind: input, shape index: {}]   ;;  %s3144_s12 = inlined_call_operand.vmem [shape: f32[2,1,32], index: 12, kind: input, shape index: {}]   ;;  %s3145_s13 = inlined_call_operand.hbm [shape: f32[2,8,32], index: 13, kind: output, shape index: {}]  }
   0x1   :  { %3149 = sst [smem:[#allocation10_spill]] %s3135_s3 }
   0x2   :  { %3150 = sst [smem:[#allocation11_spill]] %s3137_s5 }
   0x3   :  { %3151 = sst [smem:[#allocation12_spill]] %s3145_s13 }
   0x4   :  { %18 = vsyncpa [#allocation4], 0  ;;  %s2708_s25 = smov 0   ;;  %s2710_s26 = smov 0  }
   0x5   :  { %s2712_s27 = smov 0  }
   0x6 LB: > { %3152 = sst [smem:[#allocation6_spill]] %s2620_s26  ;;  %s33_s29 = sadd.s32 1, %s2620_s26  ;;  %s2624_s27 = sphi %s2712_s27, %s24_s27   ;;  %s2620_s26 = sphi %s2710_s26, %s3169_s26   ;;  %s2616_s25 = sphi %s2708_s25, %s3168_s25  }
   0x7   : > { %3153 = sst [smem:[#allocation7_spill]] %s2624_s27  ;;  %p34_p0 = scmp.ge.s32.totalorder %s33_s29, 2 }
   0x8   : > { %p2199_p1 = scmp.ge.s32.totalorder %s2624_s27, 1  ;;  %p505_p2 = scmp.lt.s32.totalorder %s2624_s27, 3 }
   0x9   : > { %s3171_s29 = smov (%p34_p0, %s33_s29), 0 }
   0xa   : > { %3154 = sst [smem:[#allocation8_spill]] %s3171_s29  ;;  %p506_p3 = pnand %p2199_p1, %p505_p2 }
   0xc   : > { %509 = sbr.rel (%p506_p3) target bundleno = 2649 (0xa59), region = 72 }
  0x11   : > { %p594_p4 = scmp.lt.s32.totalorder %s2616_s25, 1  ;;  %s3155_s3 = sld [smem:[#allocation10_spill]] }
  0x12   : > { %s3156_s5 = sld [smem:[#allocation11_spill]]  ;;  %p2208_p5 = scmp.ne.s32.totalorder %s2616_s25, 0 }
  0x13   : > { %s2731_s30 = scalar_select %p594_p4, %s2616_s25, 1 }
  0x15   : > { %s2263_s20 = sshll.u32 %s2731_s30, 4  ;;  %s618_s27 = scalar_lea.vmem %s3139_s7, %s2731_s30 }
  0x16   : > { %s621_s23 = scalar_lea.vmem %s3140_s8, %s2731_s30  ;;  %s637_s21 = scalar_lea.vmem %s3144_s12, %s2731_s30 }
  0x17   : > { %s2749_s15 = scalar_lea.vmem %s3155_s3, %s2263_s20  ;;  %s2771_s3 = scalar_lea.vmem %s3141_s9, %s2263_s20 }
  0x18   : > { %s2754_s26 = scalar_lea.vmem %s3156_s5, %s2263_s20  ;;  %s629_s5 = scalar_lea.vmem %s3142_s10, %s2731_s30 }
  0x19   : > { %3157 = sst [smem:[#allocation9_spill]] %s2754_s26  ;;  %s2266_s26 = sshll.u32 %s2731_s30, 6 }
  0x1a   : > { %s2781_s17 = scalar_lea.vmem %s3143_s11, %s2266_s26  ;;  %643 = sbr.rel (%p2208_p5) target bundleno = 33 (0x21), region = 76 }
  0x1f   : > { %v644_v0 = vld [vmem:[%s3132_s0] sm:$0xff]  ;;  %vm646_vm0 = vcmask 261120   ;;  %v645_v1 = vld [vmem:[%s3132_s0 + $0x8] sm:$0xff] }
  0x20   : > { %647 = vst.msk [vmem:[#allocation2] sm:$0xff] %vm646_vm0, %v644_v0  ;;  %648 = vst.msk [vmem:[#allocation2 + $0x8] sm:$0xff] %vm646_vm0, %v645_v1 }
  0x21 PF: > { %vm651_vm1 = vcmask 261120   ;;  %v2516_v16 = vld [vmem:[%s2749_s15 + $0x8] sm:$0xff]   ;;  %v2626_v17 = vmov 0.0   ;;  %vm2627_vm2 = vmmov 0   ;;  %v2517_v18 = vld [vmem:[%s2749_s15] sm:$0xff]   ;;  %s3158_s28 = scalar_lea.vmem %s3133_s1, %s2731_s30  ;;  %s3159_s16 = scalar_lea.vmem %s3134_s2, %s2731_s30  ;;  %vm785_vm3 = vcmask 64512  }
  0x22   : > { %2319 = vmatprep.subr.bf16.mxu0 %v2626_v17  ;;  %2323 = vmatprep.mubr.msk.bf16.mxu0 %vm2627_vm2, %v2626_v17  ;;  %v2209_v27 = vld [vmem:[%s3158_s28] ss:$0 sm:$0xff]  ;;  %s3160_s22 = scalar_lea.vmem %s3136_s4, %s2731_s30  ;;  %s2628_s20 = smov 120   ;;  %vm1281_vm4 = vcmask 1043456   ;;  %vm1687_vm5 = vcmask 130048   ;;  %vm1690_vm6 = vcmask 195584  }
  0x23   : > { %2320 = vmatpush3.bf16.msra.mxu0 %v2516_v16  ;;  %2339 = vmatprep.subr.bf16.mxu1 %v2626_v17  ;;  %v2210_v31 = vld [vmem:[%s3159_s16] ss:$0 sm:$0xff]  ;;  %s2629_s24 = smov 104   ;;  %s2630_s14 = smov 96  }
  0x24   : > { %2321 = vmatprep.subr.bf16.mxu0 %v2626_v17  ;;  %2341 = vmatprep.mubr.msk.bf16.mxu1 %vm2627_vm2, %v2626_v17  ;;  %v2211_v36 = vld [vmem:[%s3160_s22] ss:$0 sm:$0xff]  ;;  %s2631_s26 = smov 112   ;;  %s2632_s15 = smov 64  }
  0x25   : > { %s3161_s28 = sld [smem:[#allocation9_spill]]  ;;  %s2633_s29 = smov 8  }
  0x26   : > { %s2634_s13 = smov 16   ;;  %s2635_s16 = smov 24  }
  0x27   : > { %v2794_v2 = vld [vmem:[#allocation2] sm:$0xff]  ;;  %v2796_v3 = vld [vmem:[#allocation2 + $0x8] sm:$0xff]  ;;  %2322 = vmatpush3.bf16.msra.mxu0 %v2517_v18  ;;  %s3162_s22 = scalar_lea.vmem %s3138_s6, %s2731_s30  ;;  %p2258_p6 = scmp.ne.s32.totalorder %s2616_s25, 1 }
  0x28   : > { %v652_v4 = vsel %vm651_vm1, %v2794_v2, 0.0  ;;  %v655_v5 = vsel %vm651_vm1, %v2796_v3, 0.0  ;;  %2327 = vmatprep.subr.bf16.mxu0 %v2626_v17 }
  0x29   : > { %653 = vadd.xlane.f32.xlu0 %v652_v4 }
  0x2d   : > { %656 = vadd.xlane.f32.xlu0 %v655_v5 }
  0xb2   : > { %v654_v6 = vpop.xlane.xlu0 %653 }
  0xb3   : > { %v659_v7 = vmul.f32 0.03125, %v654_v6 }
  0xb5   : > { %v661_v8 = vsub.f32 %v2794_v2, %v659_v7 }
  0xb6   : > { %v657_v9 = vpop.xlane.xlu0 %656 }
  0xb7   : > { %v660_v10 = vmul.f32 0.03125, %v657_v9  ;;  %v663_v11 = vmul.f32 %v661_v8, %v661_v8 }
  0xb9   : > { %v662_v12 = vsub.f32 %v2796_v3, %v660_v10  ;;  %v665_v13 = vsel %vm651_vm1, %v663_v11, 0.0 }
  0xba   : > { %666 = vadd.xlane.f32.xlu1 %v665_v13 }
  0xbb   : > { %v664_v14 = vmul.f32 %v662_v12, %v662_v12 }
  0xbd   : > { %v668_v15 = vsel %vm651_vm1, %v664_v14, 0.0 }
  0xbe   : > { %669 = vadd.xlane.f32.xlu1 %v668_v15 }
 0x143   : > { %v667_v19 = vpop.xlane.xlu1 %666 }
 0x144   : > { %v671_v20 = vmul.f32 0.03125, %v667_v19 }
 0x146   : > { %v673_v21 = vadd.f32 1e-05, %v671_v20 }
 0x147   : > { %v670_v22 = vpop.xlane.xlu1 %669 }
 0x148   : > { %2530 = vrsqrt.f32 %v673_v21  ;;  %v672_v23 = vmul.f32 0.03125, %v670_v22 }
 0x14a   : > { %v674_v24 = vadd.f32 1e-05, %v672_v23 }
 0x14c   : > { %2532 = vrsqrt.f32 %v674_v24 }
 0x155   : > { %v2531_v25 = vpop.eup %2530 }
 0x156   : > { %v677_v26 = vmul.f32 %v2531_v25, %v661_v8 }
 0x158   : > { %v686_v30 = vmul.f32 %v2209_v27, %v677_v26 }
 0x159   : > { %v2533_v28 = vpop.eup %2532 }
 0x15a   : > { %v678_v29 = vmul.f32 %v2533_v28, %v662_v12  ;;  %v695_v33 = vadd.f32 %v2210_v31, %v686_v30 }
 0x15c   : > { %v687_v32 = vmul.f32 %v2209_v27, %v678_v29 }
 0x15e   : > { %v696_v34 = vadd.f32 %v2210_v31, %v687_v32 }
 0x160   : > { %v697_v35 = vpack.c.bf16 %v696_v34, %v695_v33 }
 0x162   : > { %2324 = vmatmul.mubr.msk.bf16.vlgmr.msra.gmra.mxu0 %vm651_vm1, %v697_v35 }
 0x163   : > { %2329 = vmatprep.mubr.msk.bf16.mxu0 %vm2627_vm2, %v2626_v17 }
 0x222   : > { %v758_v37 = vpop.f32.mrf.mxu0 }
 0x223   : > { %v759_v38 = vadd.f32 %v2211_v36, %v758_v37 }
 0x224   : > { %v2325_v39 = vpop.f32.mrf.mxu0 }
 0x225   : > { %v2834_v40 = vpack.c.bf16 %v759_v38, %v759_v38 }
 0x226   : > { %v761_v41 = vpop.f32.mrf.mxu0 }
 0x227   : > { %v762_v42 = vadd.f32 %v2211_v36, %v761_v41  ;;  %771 = vrot.lane.b32.xlu0 %v2834_v40, %s2628_s20 }
 0x228   : > { %v2326_v43 = vpop.f32.mrf.mxu0 }
 0x229   : > { %v2837_v44 = vpack.c.bf16 %v762_v42, %v762_v42 }
 0x22b   : > { %779 = vrot.lane.b32.xlu0 %v2834_v40, %s2629_s24  ;;  %773 = vrot.lane.b32.xlu1 %v2837_v44, %s2628_s20 }
 0x22f   : > { %783 = vrot.lane.b32.xlu0 %v2834_v40, %s2630_s14  ;;  %775 = vrot.lane.b32.xlu1 %v2834_v40, %s2631_s26 }
 0x233   : > { %777 = vrot.lane.b32.xlu1 %v2837_v44, %s2631_s26 }
 0x237   : > { %781 = vrot.lane.b32.xlu1 %v2837_v44, %s2629_s24 }
 0x23b   : > { %832 = vrot.lane.b32.xlu1 %v2837_v44, %s2630_s14 }
 0x299   : > { %v772_v45 = vpop.permute.xlu0 %771 }
 0x29a   : > { %v2848_v46 = vcombine.low %v772_v45, %v772_v45 }
 0x29c   : > { %882 = vrot.lane.b32.xlu0 %v2848_v46, %s2630_s14 }
 0x29d   : > { %v780_v47 = vpop.permute.xlu0 %779  ;;  %v774_v48 = vpop.permute.xlu1 %773 }
 0x29e   : > { %v2852_v49 = vcombine.low %v774_v48, %v774_v48  ;;  %v2862_v55 = vcombine.low %v780_v47, %v780_v47 }
 0x2a0   : > { %932 = vrot.lane.b32.xlu1 %v2852_v49, %s2630_s14 }
 0x2a1   : > { %v784_v50 = vpop.permute.xlu0 %783  ;;  %v776_v51 = vpop.permute.xlu1 %775 }
 0x2a2   : > { %v790_v52 = vsel %vm785_vm3, %v784_v50, 0  ;;  %v2857_v53 = vcombine.low %v776_v51, %v776_v51 }
 0x2a3   : > { %2328 = vmatpush3.bf16.xpose.msra.mxu0 %v790_v52 }
 0x2a4   : > { %982 = vrot.lane.b32.xlu0 %v2857_v53, %s2630_s14  ;;  %2333 = vmatprep.subr.bf16.mxu0 %v2626_v17 }
 0x2a5   : > { %v778_v54 = vpop.permute.xlu1 %777 }
 0x2a6   : > { %v2864_v56 = vcombine.low %v778_v54, %v778_v54 }
 0x2a8   : > { %1082 = vrot.lane.b32.xlu0 %v2862_v55, %s2630_s14  ;;  %1032 = vrot.lane.b32.xlu1 %v2864_v56, %s2630_s14 }
 0x2a9   : > { %v782_v57 = vpop.permute.xlu1 %781 }
 0x2aa   : > { %v2870_v58 = vcombine.low %v782_v57, %v782_v57  ;;  %2330 = vmatmul.mubr.msk.bf16.vlgmr.msra.gmra.mxu0 %vm785_vm3, %v2834_v40 }
 0x2ab   : > { %2335 = vmatprep.mubr.msk.bf16.mxu0 %vm2627_vm2, %v2626_v17 }
 0x2ac   : > { %1132 = vrot.lane.b32.xlu1 %v2870_v58, %s2630_s14 }
 0x2ad   : > { %v833_v59 = vpop.permute.xlu1 %832 }
 0x2ae   : > { %v838_v60 = vsel %vm785_vm3, %v833_v59, 0 }
 0x2af   : > { %2334 = vmatpush3.bf16.xpose.msra.mxu0 %v838_v60 }
 0x2b0   : > { %2345 = vmatprep.subr.bf16.mxu0 %v2626_v17 }
 0x2b6   : > { %2336 = vmatmul.mubr.msk.bf16.vlgmr.msra.gmra.mxu0 %vm785_vm3, %v2837_v44 }
 0x2b7   : > { %2347 = vmatprep.mubr.msk.bf16.mxu0 %vm2627_vm2, %v2626_v17 }
 0x30e   : > { %v883_v61 = vpop.permute.xlu0 %882 }
 0x30f   : > { %v888_v62 = vsel %vm785_vm3, %v883_v61, 0 }
 0x310   : > { %2340 = vmatpush3.bf16.xpose.msra.mxu1 %v888_v62 }
 0x311   : > { %2351 = vmatprep.subr.bf16.mxu1 %v2626_v17 }
 0x312   : > { %v933_v63 = vpop.permute.xlu1 %932 }
 0x313   : > { %v938_v0 = vsel %vm785_vm3, %v933_v63, 0 }
 0x314   : > { %2346 = vmatpush3.bf16.xpose.msra.mxu0 %v938_v0 }
 0x315   : > { %2357 = vmatprep.subr.bf16.mxu0 %v2626_v17 }
 0x316   : > { %v983_v1 = vpop.permute.xlu0 %982 }
 0x317   : > { %v988_v4 = vsel %vm785_vm3, %v983_v1, 0  ;;  %2342 = vmatmul.mubr.msk.bf16.vlgmr.msra.gmra.mxu1 %vm785_vm3, %v772_v45 }
 0x318   : > { %2352 = vmatpush3.bf16.xpose.msra.mxu1 %v988_v4  ;;  %2353 = vmatprep.mubr.msk.bf16.mxu1 %vm2627_vm2, %v2626_v17 }
 0x319   : > { %2363 = vmatprep.subr.bf16.mxu1 %v2626_v17 }
 0x31a   : > { %v1033_v5 = vpop.permute.xlu1 %1032  ;;  %v1083_v7 = vpop.permute.xlu0 %1082 }
 0x31b   : > { %v1038_v6 = vsel %vm785_vm3, %v1033_v5, 0  ;;  %2348 = vmatmul.mubr.msk.bf16.vlgmr.msra.gmra.mxu0 %vm785_vm3, %v774_v48  ;;  %v1088_v8 = vsel %vm785_vm3, %v1083_v7, 0 }
 0x31c   : > { %2358 = vmatpush3.bf16.xpose.msra.mxu0 %v1038_v6  ;;  %2359 = vmatprep.mubr.msk.bf16.mxu0 %vm2627_vm2, %v2626_v17 }
 0x31d   : > { %2369 = vmatprep.subr.bf16.mxu0 %v2626_v17 }
 0x31e   : > { %v1133_v9 = vpop.permute.xlu1 %1132 }
 0x31f   : > { %2354 = vmatmul.mubr.msk.bf16.vlgmr.msra.gmra.mxu1 %vm785_vm3, %v776_v51  ;;  %v1138_v10 = vsel %vm785_vm3, %v1133_v9, 0 }
 0x320   : > { %2364 = vmatpush3.bf16.xpose.msra.mxu1 %v1088_v8  ;;  %2365 = vmatprep.mubr.msk.bf16.mxu1 %vm2627_vm2, %v2626_v17 }
 0x321   : > { %2375 = vmatprep.subr.bf16.mxu1 %v2626_v17 }
 0x323   : > { %2360 = vmatmul.mubr.msk.bf16.vlgmr.msra.gmra.mxu0 %vm785_vm3, %v778_v54 }
 0x324   : > { %2370 = vmatpush3.bf16.xpose.msra.mxu0 %v1138_v10  ;;  %2371 = vmatprep.mubr.msk.bf16.mxu0 %vm2627_vm2, %v2626_v17 }
 0x325   : > { %2381 = vmatprep.subr.bf16.mxu0 %v2626_v17 }
 0x327   : > { %2366 = vmatmul.mubr.msk.bf16.vlgmr.msra.gmra.mxu1 %vm785_vm3, %v780_v47 }
 0x328   : > { %2377 = vmatprep.mubr.msk.bf16.mxu1 %vm2627_vm2, %v2626_v17 }
 0x32b   : > { %2372 = vmatmul.mubr.msk.bf16.vlgmr.msra.gmra.mxu0 %vm785_vm3, %v782_v57 }
 0x32c   : > { %2383 = vmatprep.mubr.msk.bf16.mxu0 %vm2627_vm2, %v2626_v17 }
 0x36a   : > { %v826_v11 = vpop.f32.mrf.mxu0 }
 0x36b   : > { %v1180_v12 = vsel %vm785_vm3, %v826_v11, -inf }
 0x36c   : > { %1181 = vmax.xlane.f32.xlu0 %v1180_v12  ;;  %v2331_v13 = vpop.f32.mrf.mxu0 }
 0x36e   : > { %v829_v14 = vpop.f32.mrf.mxu0 }
 0x370   : > { %v2332_v15 = vpop.f32.mrf.mxu0 }
 0x376   : > { %v874_v16 = vpop.f32.mrf.mxu0 }
 0x377   : > { %v1183_v18 = vsel %vm785_vm3, %v874_v16, -inf }
 0x378   : > { %1184 = vmax.xlane.f32.xlu1 %v1183_v18  ;;  %v2337_v19 = vpop.f32.mrf.mxu0 }
 0x37a   : > { %v877_v20 = vpop.f32.mrf.mxu0 }
 0x37c   : > { %v2338_v21 = vpop.f32.mrf.mxu0 }
 0x3d7   : > { %v924_v22 = vpop.f32.mrf.mxu1 }
 0x3d8   : > { %v1186_v23 = vsel %vm785_vm3, %v924_v22, -inf }
 0x3d9   : > { %v2343_v24 = vpop.f32.mrf.mxu1  ;;  %1187 = vmax.xlane.f32.xlu0 %v1186_v23 }
 0x3db   : > { %v927_v25 = vpop.f32.mrf.mxu1  ;;  %v974_v26 = vpop.f32.mrf.mxu0 }
 0x3dc   : > { %v1189_v27 = vsel %vm785_vm3, %v974_v26, -inf }
 0x3dd   : > { %v2344_v28 = vpop.f32.mrf.mxu1  ;;  %1190 = vmax.xlane.f32.xlu0 %v1189_v27  ;;  %v2349_v29 = vpop.f32.mrf.mxu0 }
 0x3df   : > { %v977_v30 = vpop.f32.mrf.mxu0  ;;  %v2918_v31 = vpop.f32.mrf.mxu1 }
 0x3e0   : > { %v1192_v32 = vsel %vm785_vm3, %v2918_v31, -inf }
 0x3e1   : > { %v2355_v33 = vpop.f32.mrf.mxu1  ;;  %1193 = vmax.xlane.f32.xlu0 %v1192_v32  ;;  %v2350_v34 = vpop.f32.mrf.mxu0 }
 0x3e3   : > { %v1027_v35 = vpop.f32.mrf.mxu1  ;;  %v1074_v36 = vpop.f32.mrf.mxu0 }
 0x3e4   : > { %v1195_v37 = vsel %vm785_vm3, %v1074_v36, -inf }
 0x3e5   : > { %v2356_v38 = vpop.f32.mrf.mxu1  ;;  %1196 = vmax.xlane.f32.xlu1 %v1195_v37  ;;  %v2361_v39 = vpop.f32.mrf.mxu0 }
 0x3e7   : > { %v1077_v41 = vpop.f32.mrf.mxu0  ;;  %v2923_v42 = vpop.f32.mrf.mxu1 }
 0x3e8   : > { %v1198_v43 = vsel %vm785_vm3, %v2923_v42, -inf }
 0x3e9   : > { %v2367_v45 = vpop.f32.mrf.mxu1  ;;  %1199 = vmax.xlane.f32.xlu0 %v1198_v43  ;;  %v2362_v47 = vpop.f32.mrf.mxu0 }
 0x3eb   : > { %v1127_v48 = vpop.f32.mrf.mxu1  ;;  %v2927_v50 = vpop.f32.mrf.mxu0 }
 0x3ec   : > { %v1201_v0 = vsel %vm785_vm3, %v2927_v50, -inf }
 0x3ed   : > { %v2368_v51 = vpop.f32.mrf.mxu1  ;;  %v2373_v52 = vpop.f32.mrf.mxu0 }
 0x3ef   : > { %v1177_v54 = vpop.f32.mrf.mxu0 }
 0x3f1   : > { %v2374_v57 = vpop.f32.mrf.mxu0 }
 0x3f5   : > { %v1182_v59 = vpop.xlane.xlu0 %1181 }
 0x3f6   : > { %1325 = vrot.lane.b32.xlu1 %v2837_v44, %s2632_s15  ;;  %v1204_v60 = vsub.f32 %v826_v11, %v1182_v59 }
 0x3f8   : > { %v1212_v61 = vmul.f32 1.442695, %v1204_v60 }
 0x3fa   : > { %1373 = vrot.lane.b32.xlu1 %v2848_v46, %s2632_s15  ;;  %2534 = vpow2.f32 %v1212_v61 }
 0x3ff   : > { %1276 = vrot.lane.b32.xlu0 %v2834_v40, %s2632_s15 }
 0x401   : > { %v1185_v44 = vpop.xlane.xlu1 %1184 }
 0x402   : > { %v1205_v46 = vsub.f32 %v874_v16, %v1185_v44 }
 0x404   : > { %v1214_v40 = vmul.f32 1.442695, %v1205_v46 }
 0x406   : > { %2536 = vpow2.f32 %v1214_v40 }
 0x407   : > { %v2935_v62 = vpop.eup %2534 }
 0x408   : > { %v1228_v63 = vsel %vm785_vm3, %v2935_v62, 0.0 }
 0x413   : > { %v2943_v1 = vpop.eup %2536 }
 0x414   : > { %v1231_v4 = vsel %vm785_vm3, %v2943_v1, 0.0 }
 0x41e   : > { %1229 = vadd.xlane.f32.xlu0 %v1228_v63  ;;  %1202 = vmax.xlane.f32.xlu1 %v1201_v0 }
 0x42f   : > { %1421 = vrot.lane.b32.xlu1 %v2852_v49, %s2632_s15 }
 0x453   : > { %1232 = vadd.xlane.f32.xlu1 %v1231_v4 }
 0x462   : > { %v1188_v5 = vpop.xlane.xlu0 %1187 }
 0x463   : > { %v1206_v6 = vsub.f32 %v924_v22, %v1188_v5 }
 0x464   : > { %1517 = vrot.lane.b32.xlu1 %v2864_v56, %s2632_s15 }
 0x465   : > { %v1216_v7 = vmul.f32 1.442695, %v1206_v6 }
 0x466   : > { %v1191_v8 = vpop.xlane.xlu0 %1190 }
 0x467   : > { %2538 = vpow2.f32 %v1216_v7  ;;  %v1207_v10 = vsub.f32 %v974_v26, %v1191_v8 }
 0x469   : > { %v1218_v13 = vmul.f32 1.442695, %v1207_v10 }
 0x46a   : > { %v1194_v9 = vpop.xlane.xlu0 %1193 }
 0x46b   : > { %2540 = vpow2.f32 %v1218_v13  ;;  %v1208_v25 = vsub.f32 %v2918_v31, %v1194_v9 }
 0x46d   : > { %v1220_v26 = vmul.f32 1.442695, %v1208_v25 }
 0x46e   : > { %v1197_v49 = vpop.xlane.xlu1 %1196 }
 0x46f   : > { %v1209_v14 = vsub.f32 %v1074_v36, %v1197_v49 }
 0x471   : > { %v1222_v19 = vmul.f32 1.442695, %v1209_v14 }
 0x472   : > { %v1200_v11 = vpop.xlane.xlu0 %1199  ;;  %v1326_v12 = vpop.permute.xlu1 %1325 }
 0x473   : > { %v1331_v15 = vsel %vm1281_vm4, %v1326_v12, 0  ;;  %2542 = vpow2.f32 %v1222_v19  ;;  %v1210_v27 = vsub.f32 %v2923_v42, %v1200_v11 }
 0x474   : > { %v2950_v16 = vpop.eup %2538  ;;  %2382 = vmatpush3.bf16.msra.mxu0 %v1331_v15  ;;  %2544 = vpow2.f32 %v1220_v26 }
 0x475   : > { %v1234_v18 = vsel %vm785_vm3, %v2950_v16, 0.0  ;;  %2393 = vmatprep.subr.bf16.mxu0 %v2626_v17  ;;  %v1224_v28 = vmul.f32 1.442695, %v1210_v27 }
 0x476   : > { %1235 = vadd.xlane.f32.xlu0 %v1234_v18  ;;  %v1277_v56 = vpop.permute.xlu0 %1276  ;;  %v1374_v29 = vpop.permute.xlu1 %1373 }
 0x477   : > { %v1283_v20 = vsel %vm1281_vm4, %v1277_v56, 0  ;;  %2546 = vpow2.f32 %v1224_v28  ;;  %v1379_v42 = vsel %vm1281_vm4, %v1374_v29, 0 }
 0x478   : > { %2376 = vmatpush3.bf16.msra.mxu1 %v1283_v20  ;;  %v2957_v21 = vpop.eup %2540 }
 0x479   : > { %2387 = vmatprep.subr.bf16.mxu1 %v2626_v17  ;;  %v1237_v22 = vsel %vm785_vm3, %v2957_v21, 0.0 }
 0x480   : > { %v2961_v23 = vpop.eup %2542 }
 0x481   : > { %v1243_v24 = vsel %vm785_vm3, %v2961_v23, 0.0  ;;  %v2969_v30 = vpop.eup %2544 }
 0x484   : > { %v2974_v36 = vpop.eup %2546 }
 0x485   : > { %v1246_v31 = vsel %vm785_vm3, %v2974_v36, 0.0 }
 0x488   : > { %1238 = vadd.xlane.f32.xlu1 %v1237_v22 }
 0x48c   : > { %1469 = vrot.lane.b32.xlu0 %v2857_v53, %s2632_s15  ;;  %1244 = vadd.xlane.f32.xlu1 %v1243_v24  ;;  %v1240_v53 = vsel %vm785_vm3, %v2969_v30, 0.0 }
 0x4a7   : > { %v1230_v32 = vpop.xlane.xlu0 %1229  ;;  %v1203_v33 = vpop.xlane.xlu1 %1202 }
 0x4a8   : > { %2548 = vrcp.f32 %v1230_v32  ;;  %v1211_v34 = vsub.f32 %v2927_v50, %v1203_v33 }
 0x4aa   : > { %v1226_v35 = vmul.f32 1.442695, %v1211_v34 }
 0x4ab   : > { %1241 = vadd.xlane.f32.xlu0 %v1240_v53  ;;  %v1422_v45 = vpop.permute.xlu1 %1421 }
 0x4ac   : > { %2550 = vpow2.f32 %v1226_v35  ;;  %v1427_v52 = vsel %vm1281_vm4, %v1422_v45, 0 }
 0x4af   : > { %1247 = vadd.xlane.f32.xlu0 %v1246_v31 }
 0x4b5   : > { %v2549_v37 = vpop.eup %2548 }
 0x4b6   : > { %v1260_v38 = vmul.f32 %v2549_v37, %v2935_v62 }
 0x4b8   : > { %v1268_v39 = vpack.c.bf16 %v1260_v38, %v1260_v38 }
 0x4b9   : > { %v2979_v41 = vpop.eup %2550 }
 0x4ba   : > { %2378 = vmatmul.mubr.msk.bf16.vlgmr.msra.gmra.mxu1 %vm785_vm3, %v1268_v39  ;;  %v1249_v43 = vsel %vm785_vm3, %v2979_v41, 0.0 }
 0x4bb   : > { %2388 = vmatpush3.bf16.msra.mxu1 %v1379_v42  ;;  %1250 = vadd.xlane.f32.xlu1 %v1249_v43  ;;  %v2518_v42 = vld [vmem:[%s3161_s28 + $0x8] sm:$0xff]  }
 0x4bc   : > { %2389 = vmatprep.mubr.msk.bf16.mxu1 %vm2627_vm2, %v2626_v17  ;;  %2399 = vmatprep.subr.bf16.mxu1 %v2626_v17 }
 0x4c5   : > { %1565 = vrot.lane.b32.xlu0 %v2862_v55, %s2632_s15 }
 0x4cc   : > { %1613 = vrot.lane.b32.xlu1 %v2870_v58, %s2632_s15 }
 0x4dc   : > { %v1233_v47 = vpop.xlane.xlu1 %1232 }
 0x4dd   : > { %2552 = vrcp.f32 %v1233_v47 }
 0x4e0   : > { %v1518_v54 = vpop.permute.xlu1 %1517 }
 0x4ea   : > { %v2553_v48 = vpop.eup %2552 }
 0x4eb   : > { %v1261_v50 = vmul.f32 %v2553_v48, %v2943_v1  ;;  %v1523_v1 = vsel %vm1281_vm4, %v1518_v54, 0 }
 0x4ed   : > { %v1269_v51 = vpack.c.bf16 %v1261_v50, %v1261_v50 }
 0x4ef   : > { %2384 = vmatmul.mubr.msk.bf16.vlgmr.msra.gmra.mxu0 %vm785_vm3, %v1269_v51  ;;  %v2519_v51 = vld [vmem:[%s3161_s28] sm:$0xff]  }
 0x4f0   : > { %2394 = vmatpush3.bf16.msra.mxu0 %v1427_v52  ;;  %2395 = vmatprep.mubr.msk.bf16.mxu0 %vm2627_vm2, %v2626_v17 }
 0x4f1   : > { %2405 = vmatprep.subr.bf16.mxu0 %v2626_v17 }
 0x4ff   : > { %v1236_v55 = vpop.xlane.xlu0 %1235 }
 0x500   : > { %2554 = vrcp.f32 %v1236_v55 }
 0x503   : > { %v1470_v59 = vpop.permute.xlu0 %1469 }
 0x504   : > { %v1475_v62 = vsel %vm1281_vm4, %v1470_v59, 0 }
 0x50d   : > { %v2555_v58 = vpop.eup %2554 }
 0x50e   : > { %v1262_v57 = vmul.f32 %v2555_v58, %v2950_v16 }
 0x510   : > { %v1270_v60 = vpack.c.bf16 %v1262_v57, %v1262_v57 }
 0x511   : > { %v1239_v61 = vpop.xlane.xlu1 %1238 }
 0x512   : > { %2556 = vrcp.f32 %v1239_v61  ;;  %2390 = vmatmul.mubr.msk.bf16.vlgmr.msra.gmra.mxu1 %vm785_vm3, %v1270_v60 }
 0x513   : > { %2400 = vmatpush3.bf16.msra.mxu1 %v1475_v62  ;;  %2401 = vmatprep.mubr.msk.bf16.mxu1 %vm2627_vm2, %v2626_v17 }
 0x514   : > { %2411 = vmatprep.subr.bf16.mxu1 %v2626_v17 }
 0x515   : > { %v1245_v63 = vpop.xlane.xlu1 %1244 }
 0x516   : > { %2558 = vrcp.f32 %v1245_v63 }
 0x51f   : > { %v2557_v0 = vpop.eup %2556 }
 0x520   : > { %v1263_v44 = vmul.f32 %v2557_v0, %v2957_v21 }
 0x522   : > { %v1271_v46 = vpack.c.bf16 %v1263_v44, %v1263_v44 }
 0x523   : > { %v2559_v40 = vpop.eup %2558 }
 0x524   : > { %2396 = vmatmul.mubr.msk.bf16.vlgmr.msra.gmra.mxu0 %vm785_vm3, %v1271_v46  ;;  %v1265_v4 = vmul.f32 %v2559_v40, %v2961_v23 }
 0x525   : > { %2406 = vmatpush3.bf16.msra.mxu0 %v1523_v1  ;;  %2407 = vmatprep.mubr.msk.bf16.mxu0 %vm2627_vm2, %v2626_v17 }
 0x526   : > { %2417 = vmatprep.subr.bf16.mxu0 %v2626_v17  ;;  %v1273_v5 = vpack.c.bf16 %v1265_v4, %v1265_v4 }
 0x52c   : > { %2408 = vmatmul.mubr.msk.bf16.vlgmr.msra.gmra.mxu0 %vm785_vm3, %v1273_v5 }
 0x52d   : > { %2419 = vmatprep.mubr.msk.bf16.mxu0 %vm2627_vm2, %v2626_v17 }
 0x534   : > { %v1242_v6 = vpop.xlane.xlu0 %1241 }
 0x535   : > { %2560 = vrcp.f32 %v1242_v6 }
 0x538   : > { %v1248_v7 = vpop.xlane.xlu0 %1247 }
 0x539   : > { %2562 = vrcp.f32 %v1248_v7 }
 0x53c   : > { %v1566_v49 = vpop.permute.xlu0 %1565 }
 0x53d   : > { %v1571_v13 = vsel %vm1281_vm4, %v1566_v49, 0 }
 0x542   : > { %v2561_v8 = vpop.eup %2560 }
 0x543   : > { %v1264_v9 = vmul.f32 %v2561_v8, %v2969_v30 }
 0x544   : > { %v1251_v10 = vpop.xlane.xlu1 %1250 }
 0x545   : > { %2564 = vrcp.f32 %v1251_v10  ;;  %v1272_v11 = vpack.c.bf16 %v1264_v9, %v1264_v9 }
 0x546   : > { %v2563_v12 = vpop.eup %2562 }
 0x547   : > { %2402 = vmatmul.mubr.msk.bf16.vlgmr.msra.gmra.mxu1 %vm785_vm3, %v1272_v11  ;;  %v1266_v16 = vmul.f32 %v2563_v12, %v2974_v36 }
 0x548   : > { %2412 = vmatpush3.bf16.msra.mxu1 %v1571_v13  ;;  %v1614_v14 = vpop.permute.xlu1 %1613  ;;  %2413 = vmatprep.mubr.msk.bf16.mxu1 %vm2627_vm2, %v2626_v17  ;;  %v2239_v13 = vld [vmem:[%s3162_s22] ss:$0 sm:$0xff] }
 0x549   : > { %v1619_v15 = vsel %vm1281_vm4, %v1614_v14, 0  ;;  %2423 = vmatprep.subr.bf16.mxu1 %v2626_v17  ;;  %v1274_v18 = vpack.c.bf16 %v1266_v16, %v1266_v16 }
 0x54a   : > { %2418 = vmatpush3.bf16.msra.mxu0 %v1619_v15 }
 0x54b   : > { %2431 = vmatprep.subr.bf16.mxu0 %v2626_v17 }
 0x54f   : > { %2414 = vmatmul.mubr.msk.bf16.vlgmr.msra.gmra.mxu1 %vm785_vm3, %v1274_v18 }
 0x550   : > { %2427 = vmatprep.mubr.msk.bf16.mxu1 %vm2627_vm2, %v2626_v17  ;;  %2424 = vmatpush3.bf16.msra.mxu1 %v2518_v42 }
 0x551   : > { %2425 = vmatprep.subr.bf16.mxu1 %v2626_v17 }
 0x552   : > { %v2565_v56 = vpop.eup %2564 }
 0x553   : > { %v1267_v19 = vmul.f32 %v2565_v56, %v2979_v41 }
 0x554   : > { %2426 = vmatpush3.bf16.msra.mxu1 %v2519_v51 }
 0x555   : > { %v1275_v20 = vpack.c.bf16 %v1267_v19, %v1267_v19  ;;  %2439 = vmatprep.subr.bf16.mxu1 %v2626_v17 }
 0x557   : > { %2420 = vmatmul.mubr.msk.bf16.vlgmr.msra.gmra.mxu0 %vm785_vm3, %v1275_v20 }
 0x558   : > { %2435 = vmatprep.mubr.msk.bf16.mxu0 %vm2627_vm2, %v2626_v17 }
 0x57a   : > { %v1319_v21 = vpop.f32.mrf.mxu1 }
 0x57c   : > { %v2379_v22 = vpop.f32.mrf.mxu1 }
 0x57e   : > { %v1322_v23 = vpop.f32.mrf.mxu1 }
 0x580   : > { %v2380_v24 = vpop.f32.mrf.mxu1 }
 0x5af   : > { %v1367_v25 = vpop.f32.mrf.mxu0 }
 0x5b1   : > { %v2385_v26 = vpop.f32.mrf.mxu0 }
 0x5b3   : > { %v1370_v27 = vpop.f32.mrf.mxu0 }
 0x5b5   : > { %v2386_v28 = vpop.f32.mrf.mxu0 }
 0x5d2   : > { %v1415_v29 = vpop.f32.mrf.mxu1 }
 0x5d4   : > { %v2391_v30 = vpop.f32.mrf.mxu1 }
 0x5d6   : > { %v1418_v32 = vpop.f32.mrf.mxu1 }
 0x5d8   : > { %v2392_v33 = vpop.f32.mrf.mxu1 }
 0x5d9   : > { %v2520_v33 = vld [vmem:[%s2771_s3 + $0x8] sm:$0xff]  }
 0x5da   : > { %2432 = vmatpush3.bf16.msra.mxu0 %v2520_v33 }
 0x5db   : > { %2433 = vmatprep.subr.bf16.mxu0 %v2626_v17 }
 0x5e4   : > { %v1463_v34 = vpop.f32.mrf.mxu0 }
 0x5e5   : > { %v2501_v35 = vpack.i.bf16 %v1463_v34, %v1415_v29  ;;  %v2521_v34 = vld [vmem:[%s2771_s3] sm:$0xff]  }
 0x5e6   : > { %v2397_v53 = vpop.f32.mrf.mxu0  ;;  %2434 = vmatpush3.bf16.msra.mxu0 %v2521_v34 }
 0x5e7   : > { %2502 = vrot.lane.b32.xlu0 %v2501_v35, %s2633_s29  ;;  %v2522_v35 = vld [vmem:[%s2781_s17 + $0x38] sm:$0xff]  }
 0x5e8   : > { %v1466_v36 = vpop.f32.mrf.mxu0 }
 0x5ea   : > { %v2398_v31 = vpop.f32.mrf.mxu0 }
 0x5ec   : > { %v1559_v37 = vpop.f32.mrf.mxu0 }
 0x5ee   : > { %v2409_v38 = vpop.f32.mrf.mxu0 }
 0x5f0   : > { %v1562_v39 = vpop.f32.mrf.mxu0 }
 0x5f2   : > { %v2410_v41 = vpop.f32.mrf.mxu0 }
 0x607   : > { %v1511_v43 = vpop.f32.mrf.mxu1 }
 0x608   : > { %v2506_v45 = vpack.i.bf16 %v1559_v37, %v1511_v43  ;;  %v2243_v43 = vld [vmem:[%s618_s27] ss:$0 sm:$0xff] }
 0x609   : > { %v2403_v47 = vpop.f32.mrf.mxu1 }
 0x60a   : > { %2507 = vrot.lane.b32.xlu1 %v2506_v45, %s2634_s13 }
 0x60b   : > { %v1514_v48 = vpop.f32.mrf.mxu1 }
 0x60d   : > { %v2404_v50 = vpop.f32.mrf.mxu1 }
 0x60e   : > { %v2244_v50 = vld [vmem:[%s621_s23] ss:$0 sm:$0xff] }
 0x60f   : > { %v1607_v52 = vpop.f32.mrf.mxu1 }
 0x611   : > { %v2415_v55 = vpop.f32.mrf.mxu1 }
 0x613   : > { %v1610_v58 = vpop.f32.mrf.mxu1 }
 0x615   : > { %v2416_v54 = vpop.f32.mrf.mxu1 }
 0x616   : > { %v2523_v54 = vld [vmem:[%s2781_s17 + $0x30] sm:$0xff]  }
 0x617   : > { %v1655_v57 = vpop.f32.mrf.mxu0 }
 0x618   : > { %v2511_v59 = vpack.i.bf16 %v1655_v57, %v1607_v52  ;;  %v2524_v57 = vld [vmem:[%s2781_s17 + $0x28] sm:$0xff]  }
 0x619   : > { %v2421_v60 = vpop.f32.mrf.mxu0 }
 0x61a   : > { %2512 = vrot.lane.b32.xlu0 %v2511_v59, %s2635_s16  ;;  %v2525_v59 = vld [vmem:[%s2781_s17 + $0x20] sm:$0xff]   ;;  %v2526_v60 = vld [vmem:[%s2781_s17 + $0x18] sm:$0xff]  }
 0x61b   : > { %v1658_v61 = vpop.f32.mrf.mxu0 }
 0x61c   : > { %v2527_v61 = vld [vmem:[%s2781_s17 + $0x10] sm:$0xff]  }
 0x61d   : > { %v2422_v62 = vpop.f32.mrf.mxu0 }
 0x61e   : > { %v2528_v62 = vld [vmem:[%s2781_s17 + $0x8] sm:$0xff]  }
 0x659   : > { %v2503_v63 = vpop.permute.xlu0 %2502 }
 0x65a   : > { %v2505_v44 = vunpack.i.h.bf16 %v2503_v63  ;;  %v2504_v46 = vunpack.i.l.bf16 %v2503_v63  ;;  %v2529_v63 = vld [vmem:[%s2781_s17] sm:$0xff]  }
 0x65c   : > { %v1686_v5 = vsel %vm785_vm3, %v1367_v25, %v2505_v44  ;;  %v1685_v6 = vsel %vm785_vm3, %v1319_v21, %v2504_v46 }
 0x67c   : > { %v2508_v0 = vpop.permute.xlu1 %2507 }
 0x67d   : > { %v2510_v40 = vunpack.i.h.bf16 %v2508_v0  ;;  %v2509_v1 = vunpack.i.l.bf16 %v2508_v0  ;;  %v2245_v0 = vld [vmem:[%s629_s5] ss:$0 sm:$0xff] }
 0x67f   : > { %v1689_v9 = vsel %vm1687_vm5, %v1686_v5, %v2510_v40  ;;  %v1688_v49 = vsel %vm1687_vm5, %v1685_v6, %v2509_v1 }
 0x68c   : > { %v2513_v4 = vpop.permute.xlu0 %2512 }
 0x68d   : > { %v2515_v7 = vunpack.i.h.bf16 %v2513_v4  ;;  %v2514_v8 = vunpack.i.l.bf16 %v2513_v4 }
 0x68f   : > { %v1692_v10 = vsel %vm1690_vm6, %v1689_v9, %v2515_v7  ;;  %v1691_v11 = vsel %vm1690_vm6, %v1688_v49, %v2514_v8 }
 0x690   : > { %v1693_v12 = vpack.c.bf16 %v1692_v10, %v1691_v11 }
 0x692   : > { %2428 = vmatmul.mubr.msk.bf16.vlgmr.msra.gmra.mxu1 %vm651_vm1, %v1693_v12 }
 0x693   : > { %2455 = vmatprep.mubr.msk.bf16.mxu1 %vm2627_vm2, %v2626_v17  ;;  %2440 = vmatpush3.bf16.msra.mxu1 %v2522_v35 }
 0x694   : > { %2441 = vmatprep.subr.bf16.mxu1 %v2626_v17 }
 0x697   : > { %2442 = vmatpush3.bf16.msra.mxu1 %v2523_v54 }
 0x698   : > { %2443 = vmatprep.subr.bf16.mxu1 %v2626_v17 }
 0x69b   : > { %2444 = vmatpush3.bf16.msra.mxu1 %v2524_v57 }
 0x69c   : > { %2445 = vmatprep.subr.bf16.mxu1 %v2626_v17 }
 0x69f   : > { %2446 = vmatpush3.bf16.msra.mxu1 %v2525_v59 }
 0x6a0   : > { %2447 = vmatprep.subr.bf16.mxu1 %v2626_v17 }
 0x6a3   : > { %2448 = vmatpush3.bf16.msra.mxu1 %v2526_v60 }
 0x6a4   : > { %2449 = vmatprep.subr.bf16.mxu1 %v2626_v17 }
 0x6a7   : > { %2450 = vmatpush3.bf16.msra.mxu1 %v2527_v61 }
 0x6a8   : > { %2451 = vmatprep.subr.bf16.mxu1 %v2626_v17 }
 0x6ab   : > { %2452 = vmatpush3.bf16.msra.mxu1 %v2528_v62 }
 0x6ac   : > { %2453 = vmatprep.subr.bf16.mxu1 %v2626_v17 }
 0x6af   : > { %2454 = vmatpush3.bf16.msra.mxu1 %v2529_v63 }
 0x752   : > { %v1754_v14 = vpop.f32.mrf.mxu1 }
 0x753   : > { %v1755_v15 = vadd.f32 %v2239_v13, %v1754_v14 }
 0x754   : > { %v2429_v16 = vpop.f32.mrf.mxu1 }
 0x755   : > { %v3046_v18 = vadd.f32 %v1755_v15, %v2794_v2  ;;  %v2249_v15 = vld [vmem:[%s637_s21] ss:$0 sm:$0xff] }
 0x756   : > { %v1757_v56 = vpop.f32.mrf.mxu1 }
 0x757   : > { %v1758_v19 = vadd.f32 %v2239_v13, %v1757_v56  ;;  %v1763_v20 = vsel %vm651_vm1, %v3046_v18, 0.0 }
 0x758   : > { %1764 = vadd.xlane.f32.xlu1 %v1763_v20  ;;  %v2430_v21 = vpop.f32.mrf.mxu1 }
 0x759   : > { %v3051_v22 = vadd.f32 %v1758_v19, %v2796_v3 }
 0x75b   : > { %v1766_v23 = vsel %vm651_vm1, %v3051_v22, 0.0 }
 0x75c   : > { %1767 = vadd.xlane.f32.xlu0 %v1766_v23 }
 0x7e1   : > { %v1765_v24 = vpop.xlane.xlu1 %1764 }
 0x7e2   : > { %v1769_v25 = vmul.f32 0.03125, %v1765_v24 }
 0x7e4   : > { %v1771_v2 = vsub.f32 %v3046_v18, %v1769_v25 }
 0x7e5   : > { %v1768_v26 = vpop.xlane.xlu0 %1767 }
 0x7e6   : > { %v1770_v27 = vmul.f32 0.03125, %v1768_v26  ;;  %v1773_v28 = vmul.f32 %v1771_v2, %v1771_v2 }
 0x7e8   : > { %v1772_v29 = vsub.f32 %v3051_v22, %v1770_v27  ;;  %v1775_v30 = vsel %vm651_vm1, %v1773_v28, 0.0 }
 0x7e9   : > { %1776 = vadd.xlane.f32.xlu0 %v1775_v30 }
 0x7ea   : > { %v1774_v3 = vmul.f32 %v1772_v29, %v1772_v29 }
 0x7ec   : > { %v1778_v32 = vsel %vm651_vm1, %v1774_v3, 0.0 }
 0x7ed   : > { %1779 = vadd.xlane.f32.xlu0 %v1778_v32 }
 0x872   : > { %v1777_v53 = vpop.xlane.xlu0 %1776 }
 0x873   : > { %v1781_v36 = vmul.f32 0.03125, %v1777_v53 }
 0x875   : > { %v1783_v31 = vadd.f32 1e-05, %v1781_v36 }
 0x876   : > { %v1780_v37 = vpop.xlane.xlu0 %1779 }
 0x877   : > { %2566 = vrsqrt.f32 %v1783_v31  ;;  %v1782_v38 = vmul.f32 0.03125, %v1780_v37 }
 0x879   : > { %v1784_v39 = vadd.f32 1e-05, %v1782_v38 }
 0x87b   : > { %2568 = vrsqrt.f32 %v1784_v39 }
 0x884   : > { %v2567_v41 = vpop.eup %2566 }
 0x885   : > { %v1787_v42 = vmul.f32 %v2567_v41, %v1771_v2 }
 0x887   : > { %v1796_v48 = vmul.f32 %v2243_v43, %v1787_v42 }
 0x888   : > { %v2569_v45 = vpop.eup %2568 }
 0x889   : > { %v1788_v47 = vmul.f32 %v2569_v45, %v1772_v29  ;;  %v1805_v52 = vadd.f32 %v2244_v50, %v1796_v48 }
 0x88b   : > { %v1797_v51 = vmul.f32 %v2243_v43, %v1788_v47 }
 0x88d   : > { %v1806_v55 = vadd.f32 %v2244_v50, %v1797_v51 }
 0x88f   : > { %v1807_v58 = vpack.c.bf16 %v1806_v55, %v1805_v52 }
 0x891   : > { %2436 = vmatmul.mubr.msk.bf16.vlgmr.msra.gmra.mxu0 %vm651_vm1, %v1807_v58 }
 0x951   : > { %v1868_v44 = vpop.f32.mrf.mxu0 }
 0x952   : > { %v1869_v46 = vadd.f32 %v2245_v0, %v1868_v44 }
 0x953   : > { %v2437_v40 = vpop.f32.mrf.mxu0 }
 0x954   : > { %v1877_v1 = vmul.f32 0.70710677, %v1869_v46  ;;  %v1875_v49 = vmul.f32 0.5, %v1869_v46 }
 0x955   : > { %v1871_v4 = vpop.f32.mrf.mxu0 }
 0x956   : > { %2570 = verf.f32 %v1877_v1  ;;  %v1872_v5 = vadd.f32 %v2245_v0, %v1871_v4 }
 0x957   : > { %v2438_v6 = vpop.f32.mrf.mxu0 }
 0x958   : > { %v1878_v7 = vmul.f32 0.70710677, %v1872_v5  ;;  %v1876_v10 = vmul.f32 0.5, %v1872_v5 }
 0x95a   : > { %2572 = verf.f32 %v1878_v7 }
 0x963   : > { %v2571_v8 = vpop.eup %2570 }
 0x964   : > { %v1881_v17 = vadd.f32 1.0, %v2571_v8 }
 0x966   : > { %v1883_v12 = vmul.f32 %v1881_v17, %v1875_v49 }
 0x967   : > { %v2573_v9 = vpop.eup %2572 }
 0x968   : > { %v1882_v11 = vadd.f32 1.0, %v2573_v9 }
 0x96a   : > { %v1884_v13 = vmul.f32 %v1882_v11, %v1876_v10 }
 0x96c   : > { %v1885_v14 = vpack.c.bf16 %v1884_v13, %v1883_v12 }
 0x96e   : > { %2456 = vmatmul.mubr.bf16.vlgmr.msra.gmra.mxu1 %v1885_v14 }
 0xa2e   : > { %v1991_v16 = vpop.f32.mrf.mxu1 }
 0xa2f   : > { %v1992_v56 = vadd.f32 %v2249_v15, %v1991_v16 }
 0xa30   : > { %v2457_v19 = vpop.f32.mrf.mxu1 }
 0xa31   : > { %v1998_v20 = vadd.f32 %v1992_v56, %v3046_v18 }
 0xa32   : > { %v1994_v21 = vpop.f32.mrf.mxu1 }
 0xa33   : > { %2000 = vst.msk [vmem:[#allocation2] sm:$0xff] %vm651_vm1, %v1998_v20  ;;  %v1995_v23 = vadd.f32 %v2249_v15, %v1994_v21  ;;  %2005 = sbr.rel (%p2258_p6) target bundleno = 2624 (0xa40), region = 80 }
 0xa34   : > { %v2458_v24 = vpop.f32.mrf.mxu1 }
 0xa35   : > { %v1999_v25 = vadd.f32 %v1995_v23, %v3051_v22 }
 0xa37   : > { %2001 = vst.msk [vmem:[#allocation2 + $0x8] sm:$0xff] %vm651_vm1, %v1999_v25 }
 0xa3a   : > { %v2006_v2 = vld [vmem:[#allocation2] sm:$0xff] }
 0xa3b   : > { %2008 = vst.msk [vmem:[#allocation3] sm:$0xff] %vm651_vm1, %v2006_v2 }
 0xa3e   : > { %v2007_v26 = vld [vmem:[#allocation2 + $0x8] sm:$0xff] }
 0xa3f   : > { %2009 = vst.msk [vmem:[#allocation3 + $0x8] sm:$0xff] %vm651_vm1, %v2007_v26 }
 0xa40 PF: > { %s3163_s30 = sld [smem:[#allocation7_spill]]  ;;  %s2636_s15 = smov [#allocation3]  }
 0xa41   : > { %s2019_s28 = sshll.u32 %s2636_s15, 4  ;;  %s2020_s28 = int_to_ptr.vmem [resolvable:$true] %s2019_s28 }
 0xa42   : > { %s2574_s13 = scalar_lea.vmem %s2020_s28, 256  ;;  %p2581_p11 = scmp.lt.s32.totalorder %s2020_s28, %s2020_s28 }
 0xa43   : > { %p2575_p8 = scmp.ne.s32.totalorder %s2020_s28, %s2574_s13  ;;  %p2582_p12 = scmp.lt.s32.totalorder %s2574_s13, %s2574_s13 }
 0xa45   : > { %p2583_p13 = por %p2582_p12, %p2581_p11 }
 0xa46   : > { %s3164_s21 = sadd.s32 4294967295, %s3163_s30  }
 0xa47   : > { %p3107_p7 = scmp.eq.s32.totalorder %s3164_s21, 1 }
 0xa49   : > { %p2576_p9 = pnand %p2575_p8, %p3107_p7 }
 0xa4b   : > { %p2577_p10 = pneg %p2576_p9 }
 0xa4d   : > { %p2584_p0 = pnand %p2583_p13, %p2577_p10 }
 0xa4f   : > { %2587 = shalt.err (!%p2584_p0)
}
 0xa50   : > { %s2637_s25 = smov 128   ;;  %s3166_s18 = sld [smem:[#allocation12_spill]] }
 0xa56   : > { %2460 = dma.vmem_to_hbm [thread:$0]  (%p3107_p7), %s2020_s28, 256, %s3166_s18, [#allocation4], %s2637_s25, %s2637_s25, %s2633_s29  }
 0xa57   : > { %2611 = dma.done.wait (%p3107_p7), [#allocation4], 256  }
 0xa58   : > { %2613 = vsyncadd (%p3107_p7), [#allocation4], 4294967040 }
 0xa59 PF: > { %s3167_s22 = sld [smem:[#allocation7_spill]] }
 0xa5a   : > { %s3168_s25 = sld [smem:[#allocation6_spill]] }
 0xa5b   : > { %s3169_s26 = sld [smem:[#allocation8_spill]] }
 0xa5f   : > { %s24_s27 = sadd.s32 1, %s3167_s22  }
 0xa60   : > { %p21_p1 = scmp.ge.s32.totalorder %s24_s27, 4  }
 0xa62   :  { %23 = sbr.rel (!%p21_p1) target bundleno = 6 (0x6), region = 144 }
 0xa67   :  { %2035 = vsyncpa [#allocation4], 1 }
 0xa68   :  { %2037 = vsyncpa [#allocation4 + $0x1], 1 }

</bundles_post_ra>
